<compile_context>
chip_gen: v7x
topology: tpu7x:2x2x1
jax: 0.10.0
libtpu: 0.0.40
codegen_flags: <defaults>
</compile_context>

<pallas_src>
import functools

import numpy as np
import jax
import jax.numpy as jnp
from jax.experimental import pallas as pl
from jax.experimental.pallas import tpu as pltpu


# -----------------------------------------------------------------------------
# Pallas kernel: one decoder stage, one image per grid step =
#   fused [bilinear row-interp] + 2 x [sep-conv + BN + SiLU]  (3 MXU matmuls).
# -----------------------------------------------------------------------------
def _stage_kernel(xa_ref, xb_ref, ih_ref, w1_ref, sb1_ref, w2_ref, sb2_ref,
                  o_ref):
    # xa_ref : (H, W*Cs)    skip feature, lane-dense, f32
    # xb_ref : (h, w*Cu)    raw coarse feature (pre-upsample), f32
    # ih_ref : (H, h)       bilinear row-interp matrix (align_corners + pad)
    # w1_ref : (3*(W*Cs + w*Cu), W*Cmid)  K-stacked banded dw*pw weights, bf16
    #                       (W-direction interp folded in for the coarse part)
    # sb1_ref: (2, W*Cmid)  row0 = folded BN scale, row1 = folded BN bias
    # w2_ref : (3*W*Cmid, W*Cout)         K-stacked banded weights, bf16
    # sb2_ref: (2, W*Cout)
    # o_ref  : (H, W*Cout)  lane-dense output, f32
    xa = xa_ref[...]
    xb = xb_ref[...]
    H = xa.shape[0]

    # Fused bilinear 2x upsample, H direction (W direction folded into w1).
    xh = jnp.dot(ih_ref[...], xb, preferred_element_type=jnp.float32)

    x = jnp.concatenate([xa, xh], axis=-1)                 # (H, W*Cs + w*Cu)

    def stack_row_taps(t):
        # [t, t[r-1], t[r+1]] along lanes; image top/bottom rows zero-padded.
        row = jax.lax.broadcasted_iota(jnp.int32, t.shape, 0)
        dn = jnp.where(row == 0, 0.0, pltpu.roll(t, 1, axis=0))
        up = jnp.where(row == H - 1, 0.0, pltpu.roll(t, H - 1, axis=0))
        return jnp.concatenate([t, dn, up], axis=-1).astype(jnp.bfloat16)

    def sep_conv_bn_silu(t, w_ref, sb_ref):
        # One K-stacked bf16 MXU matmul == dw3x3 + pw1x1 (dx / channel sums
        # and the W-tap band folded into the weight on the host); f32 accum.
        y = jnp.dot(stack_row_taps(t), w_ref[...],
                    preferred_element_type=jnp.float32)
        y = y * sb_ref[0:1] + sb_ref[1:2]          # folded BN (+ dw bias)
        return y * jax.nn.sigmoid(y)               # SiLU; Dropout == identity

    y = sep_conv_bn_silu(x, w1_ref, sb1_ref)       # (H, W*Cmid)
    o_ref[...] = sep_conv_bn_silu(y, w2_ref, sb2_ref).astype(o_ref.dtype)


# -----------------------------------------------------------------------------
# Host-side weight preprocessing (numpy; hoisted out of the jitted forward)
# -----------------------------------------------------------------------------
def _banded_weight(dw, pw, W):
    """dw: (3,3,Cin), pw: (Cin,Cout) -> B: (3, W*Cin, W*Cout) numpy f32 with
    B[dy, wi*Cin+ci, wo*Cout+co] = dw[dy, wi-wo+1, ci] * pw[ci, co] inside the
    3-wide band (SAME padding along W -> zero outside)."""
    dw = np.asarray(dw, np.float32)
    pw = np.asarray(pw, np.float32)
    Cin, Cout = pw.shape
    wf = dw[:, :, :, None] * pw[None, None, :, :]              # (3,3,Cin,Cout)
    wi = np.arange(W)[:, None]
    wo = np.arange(W)[None, :]
    dx = wi - wo + 1
    valid = ((dx >= 0) & (dx <= 2)).astype(np.float32)         # (W,W)
    dxc = np.clip(dx, 0, 2)
    band = wf[:, dxc, :, :] * valid[None, :, :, None, None]    # (3,W,W,Cin,Cout)
    band = np.transpose(band, (0, 1, 3, 2, 4))                 # (3,W,Cin,W,Cout)
    return band.reshape(3, W * Cin, W * Cout)


def _interp_matrix(n_in, n_out, pad_lo, total):
    """(total, n_in) bilinear (align_corners=True) interpolation matrix for
    n_in -> n_out upsampling placed at row offset pad_lo inside `total` rows
    (rows outside the window stay zero == the center pad)."""
    m = np.zeros((total, n_in), np.float32)
    for r in range(n_out):
        if n_in == 1:
            m[pad_lo + r, 0] = 1.0
            continue
        src = r * (n_in - 1) / (n_out - 1)
        i0 = int(np.floor(src))
        i1 = min(i0 + 1, n_in - 1)
        f = src - i0
        m[pad_lo + r, i0] += 1.0 - f
        m[pad_lo + r, i1] += f
    return m


def prepare_stage(p, skip_shape, up_shape):
    """Once-per-weight-set host prep: band construction, fold of the
    W-direction bilinear interp into the coarse-part weights, K-stacking of
    the three row taps, BN / depthwise-bias fold, bf16 cast."""
    _, H, W, Cs = skip_shape
    _, h, w, Cu = up_shape
    pw1 = np.asarray(p["pw1"], np.float32)
    pw2 = np.asarray(p["pw2"], np.float32)

    # bilinear 2x (align_corners=True) then center pad to the skip resolution
    Ho, Wo = 2 * h, 2 * w
    dyp, dxp = H - Ho, W - Wo
    ih = _interp_matrix(h, Ho, dyp // 2, H)                    # (H, h)
    iw = _interp_matrix(w, Wo, dxp // 2, W)                    # (W, w)
    col = np.kron(iw.T, np.eye(Cu, dtype=np.float32))          # (w*Cu, W*Cu)

    dw1 = np.asarray(p["dw1"], np.float32)
    Ba = _banded_weight(dw1[:, :, :Cs], pw1[:Cs], W)           # (3, W*Cs, W*Cmid)
    Bb = _banded_weight(dw1[:, :, Cs:], pw1[Cs:], W)           # (3, W*Cu, W*Cmid)
    Bb = np.einsum("kc,dcm->dkm", col, Bb)                     # fold W-interp
    B2 = _banded_weight(p["dw2"], pw2, W)                      # (3, W*Cmid, W*Cout)

    # K-stacked weights; tap order [center, r-1, r+1] matches the kernel lanes.
    w1 = np.concatenate([Ba[1], Bb[1], Ba[0], Bb[0], Ba[2], Bb[2]], axis=0)
    w2 = np.concatenate([B2[1], B2[0], B2[2]], axis=0)

    def fold_sb(s, b, db, pw):
        s = np.asarray(s, np.float32).reshape(-1)
        b = np.asarray(b, np.float32).reshape(-1) + s * (
            np.asarray(db, np.float32).reshape(-1) @ pw)       # fold dw bias
        return np.stack([np.tile(s, W), np.tile(b, W)]).astype(np.float32)

    return dict(ih=jnp.asarray(ih),
                w1=jnp.asarray(w1, jnp.bfloat16),
                sb1=jnp.asarray(fold_sb(p["s1"], p["b1"], p["db1"], pw1)),
                w2=jnp.asarray(w2, jnp.bfloat16),
                sb2=jnp.asarray(fold_sb(p["s2"], p["b2"], p["db2"], pw2)))


# -----------------------------------------------------------------------------
# Pallas wrapper (one pallas_call per decoder stage; nothing else in between)
# -----------------------------------------------------------------------------
def pallas_upsampling_block(x_skip, x_up, prep):
    """x_skip: (N,H,W,Cs) NHWC skip feature; x_up: (N,h,w,Cu) coarse feature.
    Upsample + pad + concat + double sep-conv are all fused in the kernel."""
    N, H, W, Cs = x_skip.shape
    _, h, w, Cu = x_up.shape
    Lout = prep["w2"].shape[1]
    Cout = Lout // W
    assert H % 8 == 0 and h % 8 == 0, "row tiles must be sublane-aligned"
    # (W*C lane widths are multiples of 128 in this config -> unmasked stores;
    #  other channel counts stay correct but degrade to masked vst.)

    xa = x_skip.reshape(N * H, W * Cs)        # free row-major collapse
    xb = x_up.reshape(N * h, w * Cu)
    ih, w1, sb1, w2, sb2 = (prep["ih"], prep["w1"], prep["sb1"],
                            prep["w2"], prep["sb2"])

    out2d = pl.pallas_call(
        _stage_kernel,
        out_shape=jax.ShapeDtypeStruct((N * H, Lout), jnp.float32),
        grid=(N,),                                      # one image per step
        in_specs=[
            pl.BlockSpec((H, W * Cs), lambda n: (n, 0)),
            pl.BlockSpec((h, w * Cu), lambda n: (n, 0)),
            pl.BlockSpec(ih.shape, lambda n: (0, 0)),   # constant -> fetched once
            pl.BlockSpec(w1.shape, lambda n: (0, 0)),
            pl.BlockSpec(sb1.shape, lambda n: (0, 0)),
            pl.BlockSpec(w2.shape, lambda n: (0, 0)),
            pl.BlockSpec(sb2.shape, lambda n: (0, 0)),
        ],
        out_specs=pl.BlockSpec((H, Lout), lambda n: (n, 0)),
        compiler_params=pltpu.CompilerParams(
            dimension_semantics=("parallel",)),         # v7x: image per core
    )(xa, xb, ih, w1, sb1, w2, sb2)
    return out2d.reshape(N, H, W, Cout)


# -----------------------------------------------------------------------------
# Pure-JAX reference (ground truth for the self-consistency check)
# -----------------------------------------------------------------------------
def bilinear_upsample_2x_align_corners(x):
    N, H, W, C = x.shape
    Ho, Wo = 2 * H, 2 * W

    def coords(n_in, n_out):
        if n_in == 1:
            z = jnp.zeros((n_out,), jnp.int32)
            return z, z, jnp.zeros((n_out,), jnp.float32)
        src = jnp.arange(n_out, dtype=jnp.float32) * (n_in - 1) / (n_out - 1)
        i0 = jnp.floor(src).astype(jnp.int32)
        i1 = jnp.minimum(i0 + 1, n_in - 1)
        return i0, i1, src - i0.astype(jnp.float32)

    y0, y1, wy = coords(H, Ho)
    x0, x1, wx = coords(W, Wo)
    rows = x[:, y0] * (1.0 - wy)[None, :, None, None] + x[:, y1] * wy[None, :, None, None]
    return (rows[:, :, x0] * (1.0 - wx)[None, None, :, None]
            + rows[:, :, x1] * wx[None, None, :, None])


def _upsample_and_pad(x_skip, x_up):
    x1u = bilinear_upsample_2x_align_corners(x_up)
    dyp = x_skip.shape[1] - x1u.shape[1]
    dxp = x_skip.shape[2] - x1u.shape[2]
    if dyp or dxp:
        x1u = jnp.pad(x1u, ((0, 0), (dyp // 2, dyp - dyp // 2),
                            (dxp // 2, dxp - dxp // 2), (0, 0)))
    return x1u


def ref_double_sepconv(x, p):
    def dwconv(x, w, b):
        C = x.shape[-1]
        k = w.reshape(3, 3, 1, C)
        y = jax.lax.conv_general_dilated(
            x, k, (1, 1), "SAME",
            dimension_numbers=("NHWC", "HWIO", "NHWC"), feature_group_count=C)
        return y + b.reshape(1, 1, 1, C)

    def pw(x, w):
        return jnp.einsum("nhwc,cd->nhwd", x, w)

    y = dwconv(x, p["dw1"], p["db1"])
    y = pw(y, p["pw1"]) * p["s1"].reshape(1, 1, 1, -1) + p["b1"].reshape(1, 1, 1, -1)
    y = y * jax.nn.sigmoid(y)
    y = dwconv(y, p["dw2"], p["db2"])
    y = pw(y, p["pw2"]) * p["s2"].reshape(1, 1, 1, -1) + p["b2"].reshape(1, 1, 1, -1)
    return y * jax.nn.sigmoid(y)


def ref_upsampling_block(x_skip, x_up, p):
    x1u = _upsample_and_pad(x_skip, x_up)
    x = jnp.concatenate([x_skip, x1u], axis=-1)   # == torch.cat([x2, x1], dim=1)
    return ref_double_sepconv(x, p)


# -----------------------------------------------------------------------------
# Decoder glue (NCHW boundary, NHWC internally)
# -----------------------------------------------------------------------------
def decoder_3_stage_forward(x2, x3, x4, a_up1, a_up2, block_fn):
    """a_up* are whatever block_fn consumes (prepped weights for Pallas, raw
    params for the reference)."""
    to_nhwc = lambda t: jnp.transpose(t, (0, 2, 3, 1))
    to_nchw = lambda t: jnp.transpose(t, (0, 3, 1, 2))
    xd = x4
    xc_h = block_fn(to_nhwc(x3), to_nhwc(x4), a_up1)   # up1(x4, x3)
    xb_h = block_fn(to_nhwc(x2), xc_h, a_up2)          # up2(xc, x2)
    return to_nchw(xb_h), to_nchw(xc_h), xd


# -----------------------------------------------------------------------------
# Deterministic parameters (BN folded to scale/bias, eps=1e-5)
# -----------------------------------------------------------------------------
def make_conv_params(key, cin, cout, eps=1e-5):
    ks = jax.random.split(key, 16)

    def rn(k, shape, scale):
        return (scale * jax.random.normal(k, shape)).astype(jnp.float32)

    def one_conv(keys, ci, co):
        dw = rn(keys[0], (3, 3, ci), 0.3)
        db = rn(keys[1], (1, 1, ci), 0.1)
        pw = rn(keys[2], (ci, co), 1.0 / np.sqrt(ci))
        pwb = rn(keys[3], (co,), 0.1)
        gamma = 1.0 + rn(keys[4], (co,), 0.1)
        beta = rn(keys[5], (co,), 0.1)
        rmean = rn(keys[6], (co,), 0.1)
        rvar = 1.0 + jnp.abs(rn(keys[7], (co,), 0.1))
        s = (gamma / jnp.sqrt(rvar + eps)).astype(jnp.float32)
        b = (beta + s * (pwb - rmean)).astype(jnp.float32)
        return dw, db, pw, s.reshape(1, 1, co), b.reshape(1, 1, co)

    dw1, db1, pw1, s1, b1 = one_conv(ks[:8], cin, cout)
    dw2, db2, pw2, s2, b2 = one_conv(ks[8:], cout, cout)
    return dict(dw1=dw1, db1=db1, pw1=pw1, s1=s1, b1=b1,
                dw2=dw2, db2=db2, pw2=pw2, s2=s2, b2=b2)


if __name__ == "__main__":
    key = jax.random.PRNGKey(0)
    in_ch = 16                      # bilinear=True -> factor=2, out_ch = in_ch // 4
    out_ch = in_ch // 4
    N, H4, W4 = 2, 8, 8

    k1, k2, k3, k4, k5 = jax.random.split(key, 5)
    # PyTorch NCHW inputs (x4 deepest / smallest spatial)
    x4 = jax.random.normal(k1, (N, in_ch, H4, W4), jnp.float32)
    x3 = jax.random.normal(k2, (N, in_ch // 2, 2 * H4, 2 * W4), jnp.float32)
    x2 = jax.random.normal(k3, (N, out_ch, 4 * H4, 4 * W4), jnp.float32)

    p_up1 = make_conv_params(k4, in_ch + in_ch // 2, in_ch // 2)
    p_up2 = make_conv_params(k5, in_ch // 2 + out_ch, out_ch)

    # Hoisted host-side weight prep (once per weight set, outside jit).
    prep1 = prepare_stage(p_up1,
                          skip_shape=(N, 2 * H4, 2 * W4, in_ch // 2),
                          up_shape=(N, H4, W4, in_ch))
    prep2 = prepare_stage(p_up2,
                          skip_shape=(N, 4 * H4, 4 * W4, out_ch),
                          up_shape=(N, 2 * H4, 2 * W4, in_ch // 2))

    pallas_fwd = jax.jit(functools.partial(decoder_3_stage_forward,
                                           block_fn=pallas_upsampling_block))
    xb, xc, xd = pallas_fwd(x2, x3, x4, prep1, prep2)
    jax.block_until_ready((xb, xc, xd))

    # Self-consistency vs a pure-JAX f32 reference; tolerance covers the
    # explicit bf16 MXU passes (weights/activations) inside the kernel.
    xb_r, xc_r, xd_r = decoder_3_stage_forward(x2, x3, x4, p_up1, p_up2,
                                               block_fn=ref_upsampling_block)
    np.testing.assert_allclose(np.asarray(xc), np.asarray(xc_r), atol=2e-2, rtol=2e-2)
    np.testing.assert_allclose(np.asarray(xb), np.asarray(xb_r), atol=2e-2, rtol=2e-2)
    np.testing.assert_allclose(np.asarray(xd), np.asarray(xd_r), atol=0, rtol=0)

    print("KERNEL_OK")
</pallas_src>

<mosaic_0001>
module attributes {stable_mosaic.version = 11 : i64} {
  func.func @_stage_kernel(%arg0: i32, %arg1: memref<16x128xf32, #tpu.memory_space<vmem>>, %arg2: memref<8x128xf32, #tpu.memory_space<vmem>>, %arg3: memref<16x8xf32, #tpu.memory_space<vmem>>, %arg4: memref<768x128xbf16, #tpu.memory_space<vmem>>, %arg5: memref<2x128xf32, #tpu.memory_space<vmem>>, %arg6: memref<384x128xbf16, #tpu.memory_space<vmem>>, %arg7: memref<2x128xf32, #tpu.memory_space<vmem>>, %arg8: memref<16x128xf32, #tpu.memory_space<vmem>>) attributes {dimension_semantics = [#tpu.dimension_semantics<parallel>], iteration_bounds = array<i64: 2>, scalar_prefetch = 0 : i64, scratch_operands = 0 : i64, tpu.core_type = #tpu.core_type<tc>, window_params = [{transform_indices = @transform_0, window_bounds = array<i64: 16, 128>}, {transform_indices = @transform_1, window_bounds = array<i64: 8, 128>}, {pipeline_mode = #tpu.pipeline_mode<synchronous>, transform_indices = @transform_2, window_bounds = array<i64: 16, 8>}, {pipeline_mode = #tpu.pipeline_mode<synchronous>, transform_indices = @transform_3, window_bounds = array<i64: 768, 128>}, {pipeline_mode = #tpu.pipeline_mode<synchronous>, transform_indices = @transform_4, window_bounds = array<i64: 2, 128>}, {pipeline_mode = #tpu.pipeline_mode<synchronous>, transform_indices = @transform_5, window_bounds = array<i64: 384, 128>}, {pipeline_mode = #tpu.pipeline_mode<synchronous>, transform_indices = @transform_6, window_bounds = array<i64: 2, 128>}, {transform_indices = @transform_7, window_bounds = array<i64: 16, 128>}]} {
    %c0 = arith.constant 0 : index
    %c0_0 = arith.constant 0 : index
    %0 = vector.load %arg1[%c0, %c0_0] : memref<16x128xf32, #tpu.memory_space<vmem>>, vector<16x128xf32>
    %c0_1 = arith.constant 0 : index
    %c0_2 = arith.constant 0 : index
    %1 = vector.load %arg2[%c0_1, %c0_2] : memref<8x128xf32, #tpu.memory_space<vmem>>, vector<8x128xf32>
    %c0_3 = arith.constant 0 : index
    %c0_4 = arith.constant 0 : index
    %2 = vector.load %arg3[%c0_3, %c0_4] : memref<16x8xf32, #tpu.memory_space<vmem>>, vector<16x8xf32>
    %cst = arith.constant dense<0.000000e+00> : vector<16x128xf32>
    %3 = tpu.matmul %2, %1, %cst {dimension_numbers = #tpu.dot_dimension_numbers<[1], [0], [0], [1], [0, 0, 1, 1], [], []>} : vector<16x8xf32>, vector<8x128xf32>, vector<16x128xf32> -> vector<16x128xf32>
    %4 = tpu.concatenate %0, %3 in 1 : vector<16x128xf32>, vector<16x128xf32> -> vector<16x256xf32>
    %5 = tpu.iota {dimensions = array<i32: 0>} : vector<16x256xi32>
    %c0_i32 = arith.constant 0 : i32
    %6 = vector.broadcast %c0_i32 : i32 to vector<16x256xi32>
    %7 = arith.cmpi eq, %5, %6 : vector<16x256xi32>
    %c1_i32 = arith.constant 1 : i32
    %8 = tpu.dynamic_rotate %4 by %c1_i32 dim 0 : vector<16x256xf32>, i32 -> vector<16x256xf32>
    %cst_5 = arith.constant 0.000000e+00 : f32
    %9 = vector.broadcast %cst_5 : f32 to vector<16x256xf32>
    %10 = arith.select %7, %9, %8 : vector<16x256xi1>, vector<16x256xf32>
    %c15_i32 = arith.constant 15 : i32
    %11 = vector.broadcast %c15_i32 : i32 to vector<16x256xi32>
    %12 = arith.cmpi eq, %5, %11 : vector<16x256xi32>
    %c15_i32_6 = arith.constant 15 : i32
    %13 = tpu.dynamic_rotate %4 by %c15_i32_6 dim 0 : vector<16x256xf32>, i32 -> vector<16x256xf32>
    %cst_7 = arith.constant 0.000000e+00 : f32
    %14 = vector.broadcast %cst_7 : f32 to vector<16x256xf32>
    %15 = arith.select %12, %14, %13 : vector<16x256xi1>, vector<16x256xf32>
    %16 = tpu.concatenate %4, %10, %15 in 1 : vector<16x256xf32>, vector<16x256xf32>, vector<16x256xf32> -> vector<16x768xf32>
    %17 = arith.truncf %16 : vector<16x768xf32> to vector<16x768xbf16>
    %c0_8 = arith.constant 0 : index
    %c0_9 = arith.constant 0 : index
    %18 = vector.load %arg4[%c0_8, %c0_9] : memref<768x128xbf16, #tpu.memory_space<vmem>>, vector<768x128xbf16>
    %cst_10 = arith.constant dense<0.000000e+00> : vector<16x128xf32>
    %19 = tpu.matmul %17, %18, %cst_10 {dimension_numbers = #tpu.dot_dimension_numbers<[1], [0], [0], [1], [0, 0, 1, 1], [], []>} : vector<16x768xbf16>, vector<768x128xbf16>, vector<16x128xf32> -> vector<16x128xf32>
    %c0_11 = arith.constant 0 : index
    %c0_12 = arith.constant 0 : index
    %20 = vector.load %arg5[%c0_11, %c0_12] : memref<2x128xf32, #tpu.memory_space<vmem>>, vector<1x128xf32>
    %21 = vector.broadcast %20 : vector<1x128xf32> to vector<16x128xf32>
    %22 = arith.mulf %19, %21 : vector<16x128xf32>
    %c1 = arith.constant 1 : index
    %c0_13 = arith.constant 0 : index
    %23 = vector.load %arg5[%c1, %c0_13] : memref<2x128xf32, #tpu.memory_space<vmem>>, vector<1x128xf32>
    %24 = vector.broadcast %23 : vector<1x128xf32> to vector<16x128xf32>
    %25 = arith.addf %22, %24 : vector<16x128xf32>
    %26 = arith.negf %25 : vector<16x128xf32>
    %27 = math.exp %26 : vector<16x128xf32>
    %cst_14 = arith.constant 1.000000e+00 : f32
    %28 = vector.broadcast %cst_14 : f32 to vector<16x128xf32>
    %29 = arith.addf %28, %27 : vector<16x128xf32>
    %30 = arith.divf %28, %29 : vector<16x128xf32>
    %31 = arith.mulf %25, %30 : vector<16x128xf32>
    %32 = tpu.iota {dimensions = array<i32: 0>} : vector<16x128xi32>
    %c0_i32_15 = arith.constant 0 : i32
    %33 = vector.broadcast %c0_i32_15 : i32 to vector<16x128xi32>
    %34 = arith.cmpi eq, %32, %33 : vector<16x128xi32>
    %c1_i32_16 = arith.constant 1 : i32
    %35 = tpu.dynamic_rotate %31 by %c1_i32_16 dim 0 : vector<16x128xf32>, i32 -> vector<16x128xf32>
    %cst_17 = arith.constant 0.000000e+00 : f32
    %36 = vector.broadcast %cst_17 : f32 to vector<16x128xf32>
    %37 = arith.select %34, %36, %35 : vector<16x128xi1>, vector<16x128xf32>
    %c15_i32_18 = arith.constant 15 : i32
    %38 = vector.broadcast %c15_i32_18 : i32 to vector<16x128xi32>
    %39 = arith.cmpi eq, %32, %38 : vector<16x128xi32>
    %c15_i32_19 = arith.constant 15 : i32
    %40 = tpu.dynamic_rotate %31 by %c15_i32_19 dim 0 : vector<16x128xf32>, i32 -> vector<16x128xf32>
    %cst_20 = arith.constant 0.000000e+00 : f32
    %41 = vector.broadcast %cst_20 : f32 to vector<16x128xf32>
    %42 = arith.select %39, %41, %40 : vector<16x128xi1>, vector<16x128xf32>
    %43 = tpu.concatenate %31, %37, %42 in 1 : vector<16x128xf32>, vector<16x128xf32>, vector<16x128xf32> -> vector<16x384xf32>
    %44 = arith.truncf %43 : vector<16x384xf32> to vector<16x384xbf16>
    %c0_21 = arith.constant 0 : index
    %c0_22 = arith.constant 0 : index
    %45 = vector.load %arg6[%c0_21, %c0_22] : memref<384x128xbf16, #tpu.memory_space<vmem>>, vector<384x128xbf16>
    %cst_23 = arith.constant dense<0.000000e+00> : vector<16x128xf32>
    %46 = tpu.matmul %44, %45, %cst_23 {dimension_numbers = #tpu.dot_dimension_numbers<[1], [0], [0], [1], [0, 0, 1, 1], [], []>} : vector<16x384xbf16>, vector<384x128xbf16>, vector<16x128xf32> -> vector<16x128xf32>
    %c0_24 = arith.constant 0 : index
    %c0_25 = arith.constant 0 : index
    %47 = vector.load %arg7[%c0_24, %c0_25] : memref<2x128xf32, #tpu.memory_space<vmem>>, vector<1x128xf32>
    %48 = vector.broadcast %47 : vector<1x128xf32> to vector<16x128xf32>
    %49 = arith.mulf %46, %48 : vector<16x128xf32>
    %c1_26 = arith.constant 1 : index
    %c0_27 = arith.constant 0 : index
    %50 = vector.load %arg7[%c1_26, %c0_27] : memref<2x128xf32, #tpu.memory_space<vmem>>, vector<1x128xf32>
    %51 = vector.broadcast %50 : vector<1x128xf32> to vector<16x128xf32>
    %52 = arith.addf %49, %51 : vector<16x128xf32>
    %53 = arith.negf %52 : vector<16x128xf32>
    %54 = math.exp %53 : vector<16x128xf32>
    %cst_28 = arith.constant 1.000000e+00 : f32
    %55 = vector.broadcast %cst_28 : f32 to vector<16x128xf32>
    %56 = arith.addf %55, %54 : vector<16x128xf32>
    %57 = arith.divf %55, %56 : vector<16x128xf32>
    %58 = arith.mulf %52, %57 : vector<16x128xf32>
    %c0_29 = arith.constant 0 : index
    %c0_30 = arith.constant 0 : index
    %59 = vector.load %arg8[%c0_29, %c0_30] : memref<16x128xf32, #tpu.memory_space<vmem>>, vector<16x128xf32>
    tpu.vector_store %arg8[%c0_29, %c0_30], %58 {strides = array<i32>} : memref<16x128xf32, #tpu.memory_space<vmem>>, vector<16x128xf32>,
    return
  }
  func.func @transform_0(%arg0: i32) -> (i32, i32) {
    %c0_i32 = arith.constant 0 : i32
    %c0_i32_0 = arith.constant 0 : i32
    return %arg0, %c0_i32 : i32, i32
  }
  func.func @transform_1(%arg0: i32) -> (i32, i32) {
    %c0_i32 = arith.constant 0 : i32
    %c0_i32_0 = arith.constant 0 : i32
    return %arg0, %c0_i32 : i32, i32
  }
  func.func @transform_2(%arg0: i32) -> (i32, i32) {
    %c0_i32 = arith.constant 0 : i32
    %c0_i32_0 = arith.constant 0 : i32
    %c0_i32_1 = arith.constant 0 : i32
    return %c0_i32, %c0_i32_0 : i32, i32
  }
  func.func @transform_3(%arg0: i32) -> (i32, i32) {
    %c0_i32 = arith.constant 0 : i32
    %c0_i32_0 = arith.constant 0 : i32
    %c0_i32_1 = arith.constant 0 : i32
    return %c0_i32, %c0_i32_0 : i32, i32
  }
  func.func @transform_4(%arg0: i32) -> (i32, i32) {
    %c0_i32 = arith.constant 0 : i32
    %c0_i32_0 = arith.constant 0 : i32
    %c0_i32_1 = arith.constant 0 : i32
    return %c0_i32, %c0_i32_0 : i32, i32
  }
  func.func @transform_5(%arg0: i32) -> (i32, i32) {
    %c0_i32 = arith.constant 0 : i32
    %c0_i32_0 = arith.constant 0 : i32
    %c0_i32_1 = arith.constant 0 : i32
    return %c0_i32, %c0_i32_0 : i32, i32
  }
  func.func @transform_6(%arg0: i32) -> (i32, i32) {
    %c0_i32 = arith.constant 0 : i32
    %c0_i32_0 = arith.constant 0 : i32
    %c0_i32_1 = arith.constant 0 : i32
    return %c0_i32, %c0_i32_0 : i32, i32
  }
  func.func @transform_7(%arg0: i32) -> (i32, i32) {
    %c0_i32 = arith.constant 0 : i32
    %c0_i32_0 = arith.constant 0 : i32
    return %arg0, %c0_i32 : i32, i32
  }
}

module attributes {stable_mosaic.version = 11 : i64} {
  func.func @_stage_kernel(%arg0: i32, %arg1: memref<32x128xf32, #tpu.memory_space<vmem>>, %arg2: memref<16x128xf32, #tpu.memory_space<vmem>>, %arg3: memref<32x16xf32, #tpu.memory_space<vmem>>, %arg4: memref<768x128xbf16, #tpu.memory_space<vmem>>, %arg5: memref<2x128xf32, #tpu.memory_space<vmem>>, %arg6: memref<384x128xbf16, #tpu.memory_space<vmem>>, %arg7: memref<2x128xf32, #tpu.memory_space<vmem>>, %arg8: memref<32x128xf32, #tpu.memory_space<vmem>>) attributes {dimension_semantics = [#tpu.dimension_semantics<parallel>], iteration_bounds = array<i64: 2>, scalar_prefetch = 0 : i64, scratch_operands = 0 : i64, tpu.core_type = #tpu.core_type<tc>, window_params = [{transform_indices = @transform_0, window_bounds = array<i64: 32, 128>}, {transform_indices = @transform_1, window_bounds = array<i64: 16, 128>}, {pipeline_mode = #tpu.pipeline_mode<synchronous>, transform_indices = @transform_2, window_bounds = array<i64: 32, 16>}, {pipeline_mode = #tpu.pipeline_mode<synchronous>, transform_indices = @transform_3, window_bounds = array<i64: 768, 128>}, {pipeline_mode = #tpu.pipeline_mode<synchronous>, transform_indices = @transform_4, window_bounds = array<i64: 2, 128>}, {pipeline_mode = #tpu.pipeline_mode<synchronous>, transform_indices = @transform_5, window_bounds = array<i64: 384, 128>}, {pipeline_mode = #tpu.pipeline_mode<synchronous>, transform_indices = @transform_6, window_bounds = array<i64: 2, 128>}, {transform_indices = @transform_7, window_bounds = array<i64: 32, 128>}]} {
    %c0 = arith.constant 0 : index
    %c0_0 = arith.constant 0 : index
    %0 = vector.load %arg1[%c0, %c0_0] : memref<32x128xf32, #tpu.memory_space<vmem>>, vector<32x128xf32>
    %c0_1 = arith.constant 0 : index
    %c0_2 = arith.constant 0 : index
    %1 = vector.load %arg2[%c0_1, %c0_2] : memref<16x128xf32, #tpu.memory_space<vmem>>, vector<16x128xf32>
    %c0_3 = arith.constant 0 : index
    %c0_4 = arith.constant 0 : index
    %2 = vector.load %arg3[%c0_3, %c0_4] : memref<32x16xf32, #tpu.memory_space<vmem>>, vector<32x16xf32>
    %cst = arith.constant dense<0.000000e+00> : vector<32x128xf32>
    %3 = tpu.matmul %2, %1, %cst {dimension_numbers = #tpu.dot_dimension_numbers<[1], [0], [0], [1], [0, 0, 1, 1], [], []>} : vector<32x16xf32>, vector<16x128xf32>, vector<32x128xf32> -> vector<32x128xf32>
    %4 = tpu.concatenate %0, %3 in 1 : vector<32x128xf32>, vector<32x128xf32> -> vector<32x256xf32>
    %5 = tpu.iota {dimensions = array<i32: 0>} : vector<32x256xi32>
    %c0_i32 = arith.constant 0 : i32
    %6 = vector.broadcast %c0_i32 : i32 to vector<32x256xi32>
    %7 = arith.cmpi eq, %5, %6 : vector<32x256xi32>
    %c1_i32 = arith.constant 1 : i32
    %8 = tpu.dynamic_rotate %4 by %c1_i32 dim 0 : vector<32x256xf32>, i32 -> vector<32x256xf32>
    %cst_5 = arith.constant 0.000000e+00 : f32
    %9 = vector.broadcast %cst_5 : f32 to vector<32x256xf32>
    %10 = arith.select %7, %9, %8 : vector<32x256xi1>, vector<32x256xf32>
    %c31_i32 = arith.constant 31 : i32
    %11 = vector.broadcast %c31_i32 : i32 to vector<32x256xi32>
    %12 = arith.cmpi eq, %5, %11 : vector<32x256xi32>
    %c31_i32_6 = arith.constant 31 : i32
    %13 = tpu.dynamic_rotate %4 by %c31_i32_6 dim 0 : vector<32x256xf32>, i32 -> vector<32x256xf32>
    %cst_7 = arith.constant 0.000000e+00 : f32
    %14 = vector.broadcast %cst_7 : f32 to vector<32x256xf32>
    %15 = arith.select %12, %14, %13 : vector<32x256xi1>, vector<32x256xf32>
    %16 = tpu.concatenate %4, %10, %15 in 1 : vector<32x256xf32>, vector<32x256xf32>, vector<32x256xf32> -> vector<32x768xf32>
    %17 = arith.truncf %16 : vector<32x768xf32> to vector<32x768xbf16>
    %c0_8 = arith.constant 0 : index
    %c0_9 = arith.constant 0 : index
    %18 = vector.load %arg4[%c0_8, %c0_9] : memref<768x128xbf16, #tpu.memory_space<vmem>>, vector<768x128xbf16>
    %cst_10 = arith.constant dense<0.000000e+00> : vector<32x128xf32>
    %19 = tpu.matmul %17, %18, %cst_10 {dimension_numbers = #tpu.dot_dimension_numbers<[1], [0], [0], [1], [0, 0, 1, 1], [], []>} : vector<32x768xbf16>, vector<768x128xbf16>, vector<32x128xf32> -> vector<32x128xf32>
    %c0_11 = arith.constant 0 : index
    %c0_12 = arith.constant 0 : index
    %20 = vector.load %arg5[%c0_11, %c0_12] : memref<2x128xf32, #tpu.memory_space<vmem>>, vector<1x128xf32>
    %21 = vector.broadcast %20 : vector<1x128xf32> to vector<32x128xf32>
    %22 = arith.mulf %19, %21 : vector<32x128xf32>
    %c1 = arith.constant 1 : index
    %c0_13 = arith.constant 0 : index
    %23 = vector.load %arg5[%c1, %c0_13] : memref<2x128xf32, #tpu.memory_space<vmem>>, vector<1x128xf32>
    %24 = vector.broadcast %23 : vector<1x128xf32> to vector<32x128xf32>
    %25 = arith.addf %22, %24 : vector<32x128xf32>
    %26 = arith.negf %25 : vector<32x128xf32>
    %27 = math.exp %26 : vector<32x128xf32>
    %cst_14 = arith.constant 1.000000e+00 : f32
    %28 = vector.broadcast %cst_14 : f32 to vector<32x128xf32>
    %29 = arith.addf %28, %27 : vector<32x128xf32>
    %30 = arith.divf %28, %29 : vector<32x128xf32>
    %31 = arith.mulf %25, %30 : vector<32x128xf32>
    %32 = tpu.iota {dimensions = array<i32: 0>} : vector<32x128xi32>
    %c0_i32_15 = arith.constant 0 : i32
    %33 = vector.broadcast %c0_i32_15 : i32 to vector<32x128xi32>
    %34 = arith.cmpi eq, %32, %33 : vector<32x128xi32>
    %c1_i32_16 = arith.constant 1 : i32
    %35 = tpu.dynamic_rotate %31 by %c1_i32_16 dim 0 : vector<32x128xf32>, i32 -> vector<32x128xf32>
    %cst_17 = arith.constant 0.000000e+00 : f32
    %36 = vector.broadcast %cst_17 : f32 to vector<32x128xf32>
    %37 = arith.select %34, %36, %35 : vector<32x128xi1>, vector<32x128xf32>
    %c31_i32_18 = arith.constant 31 : i32
    %38 = vector.broadcast %c31_i32_18 : i32 to vector<32x128xi32>
    %39 = arith.cmpi eq, %32, %38 : vector<32x128xi32>
    %c31_i32_19 = arith.constant 31 : i32
    %40 = tpu.dynamic_rotate %31 by %c31_i32_19 dim 0 : vector<32x128xf32>, i32 -> vector<32x128xf32>
    %cst_20 = arith.constant 0.000000e+00 : f32
    %41 = vector.broadcast %cst_20 : f32 to vector<32x128xf32>
    %42 = arith.select %39, %41, %40 : vector<32x128xi1>, vector<32x128xf32>
    %43 = tpu.concatenate %31, %37, %42 in 1 : vector<32x128xf32>, vector<32x128xf32>, vector<32x128xf32> -> vector<32x384xf32>
    %44 = arith.truncf %43 : vector<32x384xf32> to vector<32x384xbf16>
    %c0_21 = arith.constant 0 : index
    %c0_22 = arith.constant 0 : index
    %45 = vector.load %arg6[%c0_21, %c0_22] : memref<384x128xbf16, #tpu.memory_space<vmem>>, vector<384x128xbf16>
    %cst_23 = arith.constant dense<0.000000e+00> : vector<32x128xf32>
    %46 = tpu.matmul %44, %45, %cst_23 {dimension_numbers = #tpu.dot_dimension_numbers<[1], [0], [0], [1], [0, 0, 1, 1], [], []>} : vector<32x384xbf16>, vector<384x128xbf16>, vector<32x128xf32> -> vector<32x128xf32>
    %c0_24 = arith.constant 0 : index
    %c0_25 = arith.constant 0 : index
    %47 = vector.load %arg7[%c0_24, %c0_25] : memref<2x128xf32, #tpu.memory_space<vmem>>, vector<1x128xf32>
    %48 = vector.broadcast %47 : vector<1x128xf32> to vector<32x128xf32>
    %49 = arith.mulf %46, %48 : vector<32x128xf32>
    %c1_26 = arith.constant 1 : index
    %c0_27 = arith.constant 0 : index
    %50 = vector.load %arg7[%c1_26, %c0_27] : memref<2x128xf32, #tpu.memory_space<vmem>>, vector<1x128xf32>
    %51 = vector.broadcast %50 : vector<1x128xf32> to vector<32x128xf32>
    %52 = arith.addf %49, %51 : vector<32x128xf32>
    %53 = arith.negf %52 : vector<32x128xf32>
    %54 = math.exp %53 : vector<32x128xf32>
    %cst_28 = arith.constant 1.000000e+00 : f32
    %55 = vector.broadcast %cst_28 : f32 to vector<32x128xf32>
    %56 = arith.addf %55, %54 : vector<32x128xf32>
    %57 = arith.divf %55, %56 : vector<32x128xf32>
    %58 = arith.mulf %52, %57 : vector<32x128xf32>
    %c0_29 = arith.constant 0 : index
    %c0_30 = arith.constant 0 : index
    %59 = vector.load %arg8[%c0_29, %c0_30] : memref<32x128xf32, #tpu.memory_space<vmem>>, vector<32x128xf32>
    tpu.vector_store %arg8[%c0_29, %c0_30], %58 {strides = array<i32>} : memref<32x128xf32, #tpu.memory_space<vmem>>, vector<32x128xf32>,
    return
  }
  func.func @transform_0(%arg0: i32) -> (i32, i32) {
    %c0_i32 = arith.constant 0 : i32
    %c0_i32_0 = arith.constant 0 : i32
    return %arg0, %c0_i32 : i32, i32
  }
  func.func @transform_1(%arg0: i32) -> (i32, i32) {
    %c0_i32 = arith.constant 0 : i32
    %c0_i32_0 = arith.constant 0 : i32
    return %arg0, %c0_i32 : i32, i32
  }
  func.func @transform_2(%arg0: i32) -> (i32, i32) {
    %c0_i32 = arith.constant 0 : i32
    %c0_i32_0 = arith.constant 0 : i32
    %c0_i32_1 = arith.constant 0 : i32
    return %c0_i32, %c0_i32_0 : i32, i32
  }
  func.func @transform_3(%arg0: i32) -> (i32, i32) {
    %c0_i32 = arith.constant 0 : i32
    %c0_i32_0 = arith.constant 0 : i32
    %c0_i32_1 = arith.constant 0 : i32
    return %c0_i32, %c0_i32_0 : i32, i32
  }
  func.func @transform_4(%arg0: i32) -> (i32, i32) {
    %c0_i32 = arith.constant 0 : i32
    %c0_i32_0 = arith.constant 0 : i32
    %c0_i32_1 = arith.constant 0 : i32
    return %c0_i32, %c0_i32_0 : i32, i32
  }
  func.func @transform_5(%arg0: i32) -> (i32, i32) {
    %c0_i32 = arith.constant 0 : i32
    %c0_i32_0 = arith.constant 0 : i32
    %c0_i32_1 = arith.constant 0 : i32
    return %c0_i32, %c0_i32_0 : i32, i32
  }
  func.func @transform_6(%arg0: i32) -> (i32, i32) {
    %c0_i32 = arith.constant 0 : i32
    %c0_i32_0 = arith.constant 0 : i32
    %c0_i32_1 = arith.constant 0 : i32
    return %c0_i32, %c0_i32_0 : i32, i32
  }
  func.func @transform_7(%arg0: i32) -> (i32, i32) {
    %c0_i32 = arith.constant 0 : i32
    %c0_i32_0 = arith.constant 0 : i32
    return %arg0, %c0_i32 : i32, i32
  }
}

</mosaic_0001>

<bundles_post_ra>
// kernel: decoder_3_stage_forward.2
= control target key start
LH: loop header
LB: loop body
LE: loop exit
PB: predicated region body
PF: predicated region fallthrough
CT: control target
= control target key end

     0   :  { %s1743_s24 = smov 0   ;;  %s2071_s0 = inlined_call_operand.vmem [shape: f32[32,128], index: 0, kind: input, shape index: {}]   ;;  %s2072_s1 = inlined_call_operand.vmem [shape: f32[16,128], index: 1, kind: input, shape index: {}]   ;;  %s2073_s2 = inlined_call_operand.vmem [shape: f32[16,8], index: 2, kind: input, shape index: {}]   ;;  %s2074_s3 = inlined_call_operand.vmem [shape: bf16[768,128], index: 3, kind: input, shape index: {}]   ;;  %s2075_s4 = inlined_call_operand.vmem [shape: f32[2,128], index: 4, kind: input, shape index: {}]   ;;  %s2076_s5 = inlined_call_operand.vmem [shape: bf16[384,128], index: 5, kind: input, shape index: {}]   ;;  %s2077_s6 = inlined_call_operand.vmem [shape: f32[2,128], index: 6, kind: input, shape index: {}]   ;;  %s2078_s7 = inlined_call_operand.vmem [shape: f32[32,128], index: 7, kind: output, shape index: {}]  }
   0x1 LB: > { %s1749_s25 = sadd.s32 4294967295, %s1698_s24   ;;  %p1352_p0 = scmp.ge.s32.totalorder %s1698_s24, 1  ;;  %s1698_s24 = sphi %s1743_s24, %s17_s24  }
   0x2   : > { %p247_p1 = scmp.lt.s32.totalorder %s1698_s24, 3 }
   0x4   : > { %p248_p2 = pnand %p1352_p0, %p247_p1 }
   0x5   : > { %p289_p3 = scmp.lt.s32.totalorder (!%p248_p2), %s1749_s25, 1  ;;  %v303_v0 = vld [vmem:[%s2073_s2] sm:$0xff] (!%p248_p2)  ;;  %vm305_vm0 = vcmask (!%p248_p2), 64512   ;;  %v1606_v3 = vld [vmem:[%s2074_s3 + $0x48] sm:$0xff] (!%p248_p2)   ;;  %v1610_v9 = vld [vmem:[%s2074_s3 + $0x50] sm:$0xff] (!%p248_p2)   ;;  %s1353_s15 = sshll.u32 (!%p248_p2), %s1749_s25, 1  ;;  %v387_v36 = vlaneseq (!%p248_p2) }
   0x6   : > { %251 = sbr.rel (%p248_p2) target bundleno = 777 (0x309), region = 48  ;;  %1570 = vmatprep.mubr.msk.f32.mxu0 (!%p248_p2), %vm305_vm0, %v303_v0  ;;  %v1604_v1 = vld [vmem:[%s2074_s3 + $0x40] sm:$0xff] (!%p248_p2)   ;;  %v304_v4 = vld [vmem:[%s2073_s2 + $0x8] sm:$0xff] (!%p248_p2)  ;;  %v1612_v11 = vld [vmem:[%s2074_s3 + $0x10] sm:$0xff] (!%p248_p2)   ;;  %p284_p4 = scmp.lt.s32.totalorder (!%p248_p2), %s1353_s15, 3  ;;  %vm1700_vm5 = vmmov (!%p248_p2), 1  }
   0x7   : > { %v1605_v2 = vld [vmem:[%s2074_s3] sm:$0xff] (!%p248_p2)   ;;  %1471 = vmatprep.subr.bf16.mxu1 (!%p248_p2), %v1604_v1  ;;  %v1608_v6 = vld [vmem:[%s2074_s3 + $0x8] sm:$0xff] (!%p248_p2)   ;;  %v1614_v13 = vld [vmem:[%s2074_s3 + $0x58] sm:$0xff] (!%p248_p2)   ;;  %v1874_v37 = vshrl.u32 (!%p248_p2), %v387_v36, 7  ;;  %vm1702_vm8 = vmmov (!%p248_p2), 0  }
   0x8   : > { %1472 = vmatpush3.bf16.msra.mxu1 (!%p248_p2), %v1605_v2  ;;  %v1607_v5 = vld [vmem:[%s2074_s3 + $0xc0] sm:$0xff] (!%p248_p2)   ;;  %v1611_v10 = vld [vmem:[%s2074_s3 + $0xc8] sm:$0xff] (!%p248_p2)   ;;  %v1615_v14 = vld [vmem:[%s2074_s3 + $0xd0] sm:$0xff] (!%p248_p2)  }
   0x9   : > { %1473 = vmatprep.subr.bf16.mxu1 (!%p248_p2), %v1606_v3  ;;  %v1609_v8 = vld [vmem:[%s2074_s3 + $0x80] sm:$0xff] (!%p248_p2)   ;;  %v1613_v12 = vld [vmem:[%s2074_s3 + $0x88] sm:$0xff] (!%p248_p2)   ;;  %v1616_v15 = vld [vmem:[%s2074_s3 + $0x18] sm:$0xff] (!%p248_p2)   ;;  %vm396_vm1 = vcmp.lt.s32.totalorder (!%p248_p2), %v1874_v37, 1  ;;  %v389_v42 = vadd.s32 (!%p248_p2), 8, %v1874_v37  ;;  %vm411_vm2 = vcmp.lt.s32.totalorder (!%p248_p2), %v1874_v37, 7 }
   0xa   : > { %v1617_v16 = vld [vmem:[%s2074_s3 + $0x90] sm:$0xff] (!%p248_p2)   ;;  %v1618_v17 = vld [vmem:[%s2074_s3 + $0x60] sm:$0xff] (!%p248_p2)   ;;  %v1619_v18 = vld [vmem:[%s2074_s3 + $0xd8] sm:$0xff] (!%p248_p2)   ;;  %vm1466_vm3 = vcmp.ne.s32.totalorder (!%p248_p2), %v1874_v37, 0 }
   0xb   : > { %v1620_v19 = vld [vmem:[%s2074_s3 + $0x20] sm:$0xff] (!%p248_p2)   ;;  %v1621_v20 = vld [vmem:[%s2074_s3 + $0x98] sm:$0xff] (!%p248_p2)   ;;  %v1622_v21 = vld [vmem:[%s2074_s3 + $0x68] sm:$0xff] (!%p248_p2)   ;;  %vm1467_vm4 = vcmp.ne.s32.totalorder (!%p248_p2), %v389_v42, 15 }
   0xc   : > { %1474 = vmatpush3.bf16.msra.mxu1 (!%p248_p2), %v1608_v6  ;;  %v1623_v22 = vld [vmem:[%s2074_s3 + $0xe0] sm:$0xff] (!%p248_p2)   ;;  %v1624_v23 = vld [vmem:[%s2074_s3 + $0x28] sm:$0xff] (!%p248_p2)   ;;  %v1626_v25 = vld [vmem:[%s2074_s3 + $0x70] sm:$0xff] (!%p248_p2)  }
   0xd   : > { %s290_s30 = scalar_select %p289_p3, %s1749_s25, 1  ;;  %1475 = vmatprep.subr.bf16.mxu1 %v1610_v9  ;;  %v1625_v24 = vld [vmem:[%s2074_s3 + $0xa0] sm:$0xff]   ;;  %v1627_v26 = vld [vmem:[%s2074_s3 + $0xe8] sm:$0xff]   ;;  %v1628_v27 = vld [vmem:[%s2074_s3 + $0x30] sm:$0xff]  }
   0xe   : > { %v1629_v28 = vld [vmem:[%s2074_s3 + $0xa8] sm:$0xff]   ;;  %v1630_v29 = vld [vmem:[%s2074_s3 + $0x78] sm:$0xff]   ;;  %v1631_v30 = vld [vmem:[%s2074_s3 + $0xf0] sm:$0xff]   ;;  %s2084_s15 = smov (!%p284_p4, %s1353_s15), 3 }
   0xf   : > { %s1355_s12 = sshll.u32 %s290_s30, 3  ;;  %v1632_v31 = vld [vmem:[%s2074_s3 + $0x38] sm:$0xff]   ;;  %v1633_v32 = vld [vmem:[%s2074_s3 + $0xb0] sm:$0xff]   ;;  %v1635_v34 = vld [vmem:[%s2074_s3 + $0x140] sm:$0xff]   ;;  %s1354_s16 = sshll.u32 %s2084_s15, 3 }
  0x10   : > { %s292_s19 = scalar_lea.vmem %s2072_s1, %s1355_s12  ;;  %1476 = vmatpush3.bf16.msra.mxu1 %v1612_v11  ;;  %v1634_v33 = vld [vmem:[%s2074_s3 + $0xf8] sm:$0xff]   ;;  %v1637_v53 = vld [vmem:[%s2074_s3 + $0x100] sm:$0xff]   ;;  %vm1895_vm6 = vmpackc.low %vm1700_vm5, %vm1466_vm3  ;;  %s297_s29 = scalar_lea.vmem %s2078_s7, %s1354_s16 }
  0x11   : > { %v302_v7 = vld [vmem:[%s292_s19] sm:$0xff]  ;;  %1477 = vmatprep.subr.bf16.mxu1 %v1614_v13  ;;  %v1636_v35 = vld [vmem:[%s2074_s3 + $0xb8] sm:$0xff]   ;;  %s287_s19 = scalar_lea.vmem %s2071_s0, %s1354_s16  ;;  %vm1907_vm7 = vmpackc.low %vm1467_vm4, %vm1700_vm5 }
  0x12   : > { %1568 = vmatprep.subr.mxu0 %v302_v7  ;;  %v1876_v38 = vld [vmem:[%s287_s19] sm:$0xff]  ;;  %v1878_v39 = vld [vmem:[%s287_s19 + $0x8] sm:$0xff]  ;;  %v1640_v1 = vld [vmem:[%s2074_s3 + $0x150] sm:$0xff]  }
  0x13   : > { %1569 = vmatpush3.msra.mxu0 %v302_v7  ;;  %v392_v40 = vrot.slane %v1876_v38, 7  ;;  %v394_v41 = vrot.slane %v1878_v39, 7  ;;  %v420_v49 = vpack.c.bf16 %v1878_v39, %v1876_v38  ;;  %v1638_v61 = vld [vmem:[%s2074_s3 + $0x148] sm:$0xff]   ;;  %v1641_v2 = vld [vmem:[%s2074_s3 + $0x110] sm:$0xff]   ;;  %v1642_v3 = vld [vmem:[%s2074_s3 + $0x158] sm:$0xff]   ;;  %v409_v11 = vrot.slane %v1878_v39, 1 }
  0x14   : > { %1571 = vmatmul.mubr.msk.f32.vlgmr.msra.gmra.mrb[0].mxu0 %vm305_vm0, %v304_v4  ;;  %1493 = vmatprep.subr.bf16.mxu0 %v1607_v5  ;;  %v1639_v0 = vld [vmem:[%s2074_s3 + $0x108] sm:$0xff]   ;;  %v1643_v4 = vld [vmem:[%s2074_s3 + $0x118] sm:$0xff]   ;;  %v1644_v5 = vld [vmem:[%s2074_s3 + $0x160] sm:$0xff]  }
  0x15   : > { %1494 = vmatpush3.bf16.msra.mxu0 %v1609_v8  ;;  %1478 = vmatpush3.bf16.msra.mxu1 %v1616_v15  ;;  %v397_v44 = vsel %vm396_vm1, %v392_v40, %v394_v41  ;;  %v399_v45 = vsel %vm396_vm1, %v394_v41, %v392_v40  ;;  %v1645_v6 = vld [vmem:[%s2074_s3 + $0x120] sm:$0xff]   ;;  %v1646_v7 = vld [vmem:[%s2074_s3 + $0x168] sm:$0xff]   ;;  %v1648_v9 = vld [vmem:[%s2074_s3 + $0x170] sm:$0xff]  }
  0x16   : > { %1495 = vmatprep.subr.bf16.mxu0 %v1611_v10  ;;  %1479 = vmatprep.subr.bf16.mxu1 %v1618_v17  ;;  %v1414_v55 = vpack.c.bf16 %v397_v44, %v399_v45  ;;  %v1647_v8 = vld [vmem:[%s2074_s3 + $0x128] sm:$0xff]   ;;  %v407_v10 = vrot.slane %v1876_v38, 1  ;;  %v1650_v13 = vld [vmem:[%s2074_s3 + $0x178] sm:$0xff]   ;;  %v1670_v38 = vld [vmem:[%s2076_s5 + $0x70] sm:$0xff]  }
  0x17   : > { %v1669_v36 = vld [vmem:[%s2076_s5 + $0x28] sm:$0xff]   ;;  %v1671_v39 = vld [vmem:[%s2076_s5 + $0xb0] sm:$0xff]   ;;  %v1673_v41 = vld [vmem:[%s2076_s5 + $0x78] sm:$0xff]  }
  0x18   : > { %v412_v15 = vsel %vm411_vm2, %v407_v10, %v409_v11  ;;  %v1672_v40 = vld [vmem:[%s2076_s5 + $0x30] sm:$0xff]   ;;  %v1674_v42 = vld [vmem:[%s2076_s5 + $0xb8] sm:$0xff]   ;;  %v1460_v37 = vld [vmem:[%s2077_s6] ss:$0 sm:$0xff] }
  0x19   : > { %1496 = vmatpush3.bf16.msra.mxu0 %v1613_v12  ;;  %1480 = vmatpush3.bf16.msra.mxu1 %v1620_v19  ;;  %v1649_v12 = vld [vmem:[%s2074_s3 + $0x130] sm:$0xff]   ;;  %v1653_v19 = vld [vmem:[%s2076_s5 + $0x80] sm:$0xff]  }
  0x1a   : > { %1497 = vmatprep.subr.bf16.mxu0 %v1615_v14  ;;  %1481 = vmatprep.subr.bf16.mxu1 %v1622_v21  ;;  %v1651_v14 = vld [vmem:[%s2074_s3 + $0x138] sm:$0xff]   ;;  %v1654_v21 = vld [vmem:[%s2076_s5] sm:$0xff]  }
  0x1b   : > { %v1461_v60 = vld [vmem:[%s2077_s6 + $0x1] ss:$0 sm:$0xff] }
  0x1d   : > { %1498 = vmatpush3.bf16.msra.mxu0 %v1617_v16  ;;  %1482 = vmatpush3.bf16.msra.mxu1 %v1624_v23  ;;  %v414_v16 = vsel %vm411_vm2, %v409_v11, %v407_v10  ;;  %v1656_v23 = vld [vmem:[%s2076_s5 + $0x88] sm:$0xff]  }
  0x1e   : > { %1499 = vmatprep.subr.bf16.mxu0 %v1619_v18  ;;  %1483 = vmatprep.subr.bf16.mxu1 %v1626_v25  ;;  %v1422_v17 = vpack.c.bf16 %v414_v16, %v412_v15  ;;  %v1652_v18 = vld [vmem:[%s2076_s5 + $0x40] sm:$0xff]   ;;  %v1658_v25 = vld [vmem:[%s2076_s5 + $0x50] sm:$0xff]  }
  0x21   : > { %1500 = vmatpush3.bf16.msra.mxu0 %v1621_v20  ;;  %1484 = vmatpush3.bf16.msra.mxu1 %v1628_v27  ;;  %v1701_v20 = vmov 0.0   ;;  %v1660_v27 = vld [vmem:[%s2076_s5 + $0x10] sm:$0xff]  }
  0x22   : > { %1501 = vmatprep.subr.bf16.mxu0 %v1623_v22  ;;  %1485 = vmatprep.subr.bf16.mxu1 %v1630_v29  ;;  %v1655_v22 = vld [vmem:[%s2076_s5 + $0x48] sm:$0xff]   ;;  %v1662_v29 = vld [vmem:[%s2076_s5 + $0x98] sm:$0xff]  }
  0x25   : > { %1502 = vmatpush3.bf16.msra.mxu0 %v1625_v24  ;;  %1486 = vmatpush3.bf16.msra.mxu1 %v1632_v31  ;;  %v1657_v24 = vld [vmem:[%s2076_s5 + $0x8] sm:$0xff]   ;;  %v1664_v31 = vld [vmem:[%s2076_s5 + $0x60] sm:$0xff]  }
  0x26   : > { %1503 = vmatprep.subr.bf16.mxu0 %v1627_v26  ;;  %1515 = vmatprep.subr.bf16.mxu1 %v1635_v34  ;;  %v1659_v26 = vld [vmem:[%s2076_s5 + $0x90] sm:$0xff]   ;;  %v1667_v34 = vld [vmem:[%s2076_s5 + $0x68] sm:$0xff]  }
  0x29   : > { %1504 = vmatpush3.bf16.msra.mxu0 %v1629_v28  ;;  %v1661_v28 = vld [vmem:[%s2076_s5 + $0x58] sm:$0xff]  }
  0x2a   : > { %1505 = vmatprep.subr.bf16.mxu0 %v1631_v30  ;;  %v1663_v30 = vld [vmem:[%s2076_s5 + $0x18] sm:$0xff]  }
  0x2d   : > { %1506 = vmatpush3.bf16.msra.mxu0 %v1633_v32  ;;  %v1665_v32 = vld [vmem:[%s2076_s5 + $0xa0] sm:$0xff]  }
  0x2e   : > { %1507 = vmatprep.subr.bf16.mxu0 %v1634_v33  ;;  %v1666_v33 = vld [vmem:[%s2076_s5 + $0x20] sm:$0xff]  }
  0x31   : > { %1508 = vmatpush3.bf16.msra.mxu0 %v1636_v35  ;;  %v1668_v35 = vld [vmem:[%s2076_s5 + $0xa8] sm:$0xff]  }
  0x32   : > { %1537 = vmatprep.subr.bf16.mxu0 %v1652_v18 }
  0xe7   : > { %v1572_v43 = vpop.f32.mrb[0].mxu0 }
  0xe8   : > { %v395_v46 = vrot.slane %v1572_v43, 7  ;;  %v410_v47 = vrot.slane %v1572_v43, 1  ;;  %v378_v48 = vpop.f32.mrb[1].mxu0 }
  0xe9   : > { %v393_v50 = vrot.slane %v378_v48, 7  ;;  %v408_v51 = vrot.slane %v378_v48, 1  ;;  %v421_v52 = vpack.c.bf16 %v1572_v43, %v378_v48  ;;  %v1675_v43 = vld [vmem:[%s2076_s5 + $0x38] sm:$0xff]  }
  0xeb   : > { %v398_v56 = vsel %vm396_vm1, %v393_v50, %v395_v46  ;;  %v400_v57 = vsel %vm396_vm1, %v395_v46, %v393_v50  ;;  %v413_v58 = vsel %vm411_vm2, %v408_v51, %v410_v47  ;;  %v415_v59 = vsel %vm411_vm2, %v410_v47, %v408_v51  ;;  %842 = vmatprep.mubr.bf16.mxu1 %v421_v52 }
  0xec   : > { %843 = vmatmul.mubr.bf16.vlgmr.msra.gmra.mrb[0].mxu1 %v420_v49  ;;  %v1410_v62 = vpack.c.bf16 %v398_v56, %v400_v57  ;;  %v1418_v63 = vpack.c.bf16 %v415_v59, %v413_v58 }
  0xed   : > { %1516 = vmatpush3.bf16.msra.mxu1 %v1637_v53 }
  0xee   : > { %1411 = vmatprep.mubr.msk.bf16.mxu0 %vm1895_vm6, %v1410_v62  ;;  %1419 = vmatprep.mubr.msk.bf16.mxu1 %vm1907_vm7, %v1418_v63 }
  0xef   : > { %1415 = vmatmul.mubr.msk.bf16.vlgmr.msra.gmra.mrb[4].mxu0 %vm1895_vm6, %v1414_v55  ;;  %1517 = vmatprep.subr.bf16.mxu1 %v1638_v61 }
  0xf0   : > { %1538 = vmatpush3.bf16.msra.mxu0 %v1654_v21 }
  0xf1   : > { %1518 = vmatpush3.bf16.msra.mxu1 %v1639_v0  ;;  %1539 = vmatprep.subr.bf16.mxu0 %v1655_v22  ;;  %v1424_v0 = vld [vmem:[%s2075_s4] ss:$0 sm:$0xff] }
  0xf2   : > { %1519 = vmatprep.subr.bf16.mxu1 %v1640_v1 }
  0xf4   : > { %1540 = vmatpush3.bf16.msra.mxu0 %v1657_v24 }
  0xf5   : > { %1520 = vmatpush3.bf16.msra.mxu1 %v1641_v2  ;;  %1541 = vmatprep.subr.bf16.mxu0 %v1658_v25 }
  0xf6   : > { %1521 = vmatprep.subr.bf16.mxu1 %v1642_v3 }
  0xf8   : > { %1542 = vmatpush3.bf16.msra.mxu0 %v1660_v27 }
  0xf9   : > { %1522 = vmatpush3.bf16.msra.mxu1 %v1643_v4  ;;  %1543 = vmatprep.subr.bf16.mxu0 %v1661_v28  ;;  %v1425_v4 = vld [vmem:[%s2075_s4 + $0x1] ss:$0 sm:$0xff] }
  0xfa   : > { %1523 = vmatprep.subr.bf16.mxu1 %v1644_v5 }
  0xfc   : > { %1544 = vmatpush3.bf16.msra.mxu0 %v1663_v30 }
  0xfd   : > { %1524 = vmatpush3.bf16.msra.mxu1 %v1645_v6  ;;  %1545 = vmatprep.subr.bf16.mxu0 %v1664_v31 }
  0xfe   : > { %1525 = vmatprep.subr.bf16.mxu1 %v1646_v7 }
 0x100   : > { %1546 = vmatpush3.bf16.msra.mxu0 %v1666_v33 }
 0x101   : > { %1526 = vmatpush3.bf16.msra.mxu1 %v1647_v8  ;;  %1547 = vmatprep.subr.bf16.mxu0 %v1667_v34 }
 0x102   : > { %1527 = vmatprep.subr.bf16.mxu1 %v1648_v9 }
 0x104   : > { %1548 = vmatpush3.bf16.msra.mxu0 %v1669_v36 }
 0x105   : > { %1528 = vmatpush3.bf16.msra.mxu1 %v1649_v12  ;;  %1549 = vmatprep.subr.bf16.mxu0 %v1670_v38 }
 0x106   : > { %1529 = vmatprep.subr.bf16.mxu1 %v1650_v13 }
 0x108   : > { %1550 = vmatpush3.bf16.msra.mxu0 %v1672_v40 }
 0x109   : > { %1530 = vmatpush3.bf16.msra.mxu1 %v1651_v14  ;;  %1551 = vmatprep.subr.bf16.mxu0 %v1673_v41 }
 0x10a   : > { %1573 = vmatprep.subr.bf16.mxu1 %v1701_v20 }
 0x10c   : > { %1423 = vmatmul.mubr.msk.bf16.vlgmr.msra.gmra.mrb[4].mxu1 %vm1907_vm7, %v1422_v17  ;;  %1552 = vmatpush3.bf16.msra.mxu0 %v1675_v43 }
 0x10d   : > { %1574 = vmatpush3.bf16.msra.mxu1 %v1653_v19  ;;  %1589 = vmatprep.mubr.msk.bf16.mxu1 %vm1702_vm8, %v1701_v20 }
 0x10e   : > { %1575 = vmatprep.subr.bf16.mxu1 %v1701_v20 }
 0x111   : > { %1576 = vmatpush3.bf16.msra.mxu1 %v1656_v23 }
 0x112   : > { %1577 = vmatprep.subr.bf16.mxu1 %v1701_v20 }
 0x115   : > { %1578 = vmatpush3.bf16.msra.mxu1 %v1659_v26 }
 0x116   : > { %1579 = vmatprep.subr.bf16.mxu1 %v1701_v20 }
 0x119   : > { %1580 = vmatpush3.bf16.msra.mxu1 %v1662_v29 }
 0x11a   : > { %1581 = vmatprep.subr.bf16.mxu1 %v1701_v20 }
 0x11d   : > { %1582 = vmatpush3.bf16.msra.mxu1 %v1665_v32 }
 0x11e   : > { %1583 = vmatprep.subr.bf16.mxu1 %v1701_v20 }
 0x121   : > { %1584 = vmatpush3.bf16.msra.mxu1 %v1668_v35 }
 0x122   : > { %1585 = vmatprep.subr.bf16.mxu1 %v1701_v20 }
 0x125   : > { %1586 = vmatpush3.bf16.msra.mxu1 %v1671_v39 }
 0x126   : > { %1587 = vmatprep.subr.bf16.mxu1 %v1701_v20 }
 0x129   : > { %1588 = vmatpush3.bf16.msra.mxu1 %v1674_v42 }
 0x1bf   : > { %v1487_v44 = vpop.f32.mrb[0].mxu1 }
 0x1c0   : > { %v1488_v45 = vpop.f32.mrb[1].mxu1 }
 0x1c1   : > { %v1489_v46 = vadd.f32 %v1488_v45, %v1487_v44  ;;  %v1490_v47 = vpop.f32.mrb[2].mxu1 }
 0x1c2   : > { %v1491_v48 = vpop.f32.mrb[3].mxu1  ;;  %v1509_v49 = vpop.f32.mrb[4].mxu0 }
 0x1c3   : > { %v1492_v50 = vadd.f32 %v1491_v48, %v1490_v47  ;;  %v1510_v51 = vpop.f32.mrb[5].mxu0 }
 0x1c4   : > { %v1511_v52 = vadd.f32 %v1510_v51, %v1509_v49  ;;  %v1512_v53 = vpop.f32.mrb[6].mxu0 }
 0x1c5   : > { %v1513_v55 = vpop.f32.mrb[7].mxu0 }
 0x1c6   : > { %v886_v56 = vadd.f32 %v1511_v52, %v1489_v46  ;;  %v1514_v57 = vadd.f32 %v1513_v55, %v1512_v53 }
 0x1c8   : > { %v889_v58 = vadd.f32 %v1514_v57, %v1492_v50 }
 0x1df   : > { %v1531_v59 = vpop.f32.mrb[4].mxu1 }
 0x1e0   : > { %v1532_v61 = vpop.f32.mrb[5].mxu1 }
 0x1e1   : > { %v1533_v62 = vadd.f32 %v1532_v61, %v1531_v59  ;;  %v1534_v63 = vpop.f32.mrb[6].mxu1 }
 0x1e2   : > { %v1535_v1 = vpop.f32.mrb[7].mxu1 }
 0x1e3   : > { %v927_v2 = vadd.f32 %v1533_v62, %v886_v56  ;;  %v1536_v3 = vadd.f32 %v1535_v1, %v1534_v63 }
 0x1e5   : > { %v938_v5 = vmul.f32 %v1424_v0, %v927_v2  ;;  %v930_v6 = vadd.f32 %v1536_v3, %v889_v58 }
 0x1e7   : > { %v945_v7 = vadd.f32 %v1425_v4, %v938_v5  ;;  %v939_v8 = vmul.f32 %v1424_v0, %v930_v6 }
 0x1e9   : > { %v1426_v9 = vmul.f32 -1.442695, %v945_v7  ;;  %v946_v10 = vadd.f32 %v1425_v4, %v939_v8 }
 0x1eb   : > { %1676 = vpow2.f32 %v1426_v9  ;;  %v1427_v11 = vmul.f32 -1.442695, %v946_v10 }
 0x1ed   : > { %1678 = vpow2.f32 %v1427_v11 }
 0x1f5   : > { %v1677_v12 = vpop.eup %1676 }
 0x1f6   : > { %v953_v13 = vadd.f32 1.0, %v1677_v12 }
 0x1f7   : > { %v1679_v14 = vpop.eup %1678 }
 0x1f8   : > { %1680 = vrcp.f32 %v953_v13  ;;  %v954_v15 = vadd.f32 1.0, %v1679_v14 }
 0x1fa   : > { %1682 = vrcp.f32 %v954_v15 }
 0x202   : > { %v1681_v16 = vpop.eup %1680 }
 0x203   : > { %v959_v17 = vmul.f32 %v1681_v16, %v945_v7 }
 0x204   : > { %v1683_v18 = vpop.eup %1682 }
 0x205   : > { %v960_v19 = vmul.f32 %v1683_v18, %v946_v10  ;;  %v967_v20 = vrot.slane %v959_v17, 1  ;;  %v961_v22 = vrot.slane %v959_v17, 7 }
 0x207   : > { %v968_v21 = vrot.slane %v960_v19, 1  ;;  %v962_v23 = vrot.slane %v960_v19, 7  ;;  %v973_v24 = vpack.c.bf16 %v960_v19, %v959_v17 }
 0x209   : > { %v963_v25 = vsel %vm396_vm1, %v961_v22, %v962_v23  ;;  %v964_v26 = vsel %vm396_vm1, %v962_v23, %v961_v22  ;;  %v969_v27 = vsel %vm411_vm2, %v967_v20, %v968_v21  ;;  %v970_v28 = vsel %vm411_vm2, %v968_v21, %v967_v20 }
 0x20a   : > { %v1454_v29 = vpack.c.bf16 %v963_v25, %v964_v26  ;;  %v1458_v30 = vpack.c.bf16 %v970_v28, %v969_v27 }
 0x20c   : > { %1455 = vmatprep.mubr.msk.bf16.mxu0 %vm1895_vm6, %v1454_v29  ;;  %1590 = vmatmul.mubr.msk.bf16.vlgmr.msra.gmra.mrb[8].mxu1 %vm1907_vm7, %v1458_v30 }
 0x20d   : > { %1201 = vmatmul.mubr.bf16.vlgmr.msra.gmra.mrb[8].mxu0 %v973_v24 }
 0x2df   : > { %v1243_v31 = vpop.f32.mrb[8].mxu1 }
 0x2e0   : > { %v1553_v32 = vpop.f32.mrb[8].mxu0  ;;  %v1591_v33 = vpop.f32.mrb[9].mxu1 }
 0x2e1   : > { %v1554_v34 = vpop.f32.mrb[9].mxu0  ;;  %v1246_v35 = vpop.f32.mrb[10].mxu1 }
 0x2e2   : > { %v1555_v36 = vadd.f32 %v1554_v34, %v1553_v32  ;;  %v1556_v38 = vpop.f32.mrb[10].mxu0  ;;  %v1592_v39 = vpop.f32.mrb[11].mxu1 }
 0x2e3   : > { %v1557_v40 = vpop.f32.mrb[11].mxu0 }
 0x2e4   : > { %v1244_v41 = vadd.f32 %v1555_v36, %v1243_v31  ;;  %v1558_v54 = vadd.f32 %v1557_v40, %v1556_v38 }
 0x2e6   : > { %v1255_v42 = vmul.f32 %v1460_v37, %v1244_v41  ;;  %v1247_v43 = vadd.f32 %v1558_v54, %v1246_v35 }
 0x2e8   : > { %v1262_v44 = vadd.f32 %v1461_v60, %v1255_v42  ;;  %v1256_v45 = vmul.f32 %v1460_v37, %v1247_v43 }
 0x2ea   : > { %v1462_v46 = vmul.f32 -1.442695, %v1262_v44  ;;  %v1263_v47 = vadd.f32 %v1461_v60, %v1256_v45 }
 0x2ec   : > { %1684 = vpow2.f32 %v1462_v46  ;;  %v1463_v48 = vmul.f32 -1.442695, %v1263_v47 }
 0x2ee   : > { %1686 = vpow2.f32 %v1463_v48 }
 0x2f6   : > { %v1685_v49 = vpop.eup %1684 }
 0x2f7   : > { %v1270_v50 = vadd.f32 1.0, %v1685_v49 }
 0x2f8   : > { %v1687_v51 = vpop.eup %1686 }
 0x2f9   : > { %1688 = vrcp.f32 %v1270_v50  ;;  %v1271_v52 = vadd.f32 1.0, %v1687_v51 }
 0x2fb   : > { %1690 = vrcp.f32 %v1271_v52 }
 0x303   : > { %v1689_v53 = vpop.eup %1688 }
 0x304   : > { %v1276_v55 = vmul.f32 %v1689_v53, %v1262_v44 }
 0x305   : > { %v1691_v56 = vpop.eup %1690 }
 0x306   : > { %1278 = vst [vmem:[%s297_s29] sm:$0xff] %v1276_v55  ;;  %v1277_v57 = vmul.f32 %v1691_v56, %v1263_v47 }
 0x308   : > { %1279 = vst [vmem:[%s297_s29 + $0x8] sm:$0xff] %v1277_v57 }
 0x309 PF: > { %s17_s24 = sadd.s32 1, %s1698_s24  }
 0x30a   : > { %p14_p5 = scmp.ge.s32.totalorder %s17_s24, 4  }
 0x30c   :  { %16 = sbr.rel (!%p14_p5) target bundleno = 1 (0x1), region = 81 }

// kernel: decoder_3_stage_forward.3
= control target key start
LH: loop header
LB: loop body
LE: loop exit
PB: predicated region body
PF: predicated region fallthrough
CT: control target
= control target key end

     0   :  { %s1954_s24 = smov 0   ;;  %s2333_s0 = inlined_call_operand.vmem [shape: f32[64,128], index: 0, kind: input, shape index: {}]   ;;  %s2334_s1 = inlined_call_operand.vmem [shape: f32[32,128], index: 1, kind: input, shape index: {}]   ;;  %s2335_s2 = inlined_call_operand.vmem [shape: f32[32,16], index: 2, kind: input, shape index: {}]   ;;  %s2336_s3 = inlined_call_operand.vmem [shape: bf16[768,128], index: 3, kind: input, shape index: {}]   ;;  %s2337_s4 = inlined_call_operand.vmem [shape: f32[2,128], index: 4, kind: input, shape index: {}]   ;;  %s2338_s5 = inlined_call_operand.vmem [shape: bf16[384,128], index: 5, kind: input, shape index: {}]   ;;  %s2339_s6 = inlined_call_operand.vmem [shape: f32[2,128], index: 6, kind: input, shape index: {}]   ;;  %s2340_s7 = inlined_call_operand.vmem [shape: f32[64,128], index: 7, kind: output, shape index: {}]  }
   0x1 LB: > { %s1503_s25 = sadd.s32 4294967295, %s1911_s24   ;;  %p1507_p0 = scmp.ge.s32.totalorder %s1911_s24, 1  ;;  %s1911_s24 = sphi %s1954_s24, %s17_s24  }
   0x2   : > { %p249_p1 = scmp.lt.s32.totalorder %s1911_s24, 3 }
   0x4   : > { %p250_p2 = pnand %p1507_p0, %p249_p1 }
   0x5   : > { %s1510_s26 = sshll.u32 (!%p250_p2), %s1503_s25, 1  ;;  %v311_v0 = vld [vmem:[%s2335_s2] sm:$0xff] (!%p250_p2)  ;;  %vm315_vm0 = vcmask (!%p250_p2), 130048   ;;  %v1803_v3 = vld [vmem:[%s2336_s3 + $0x48] sm:$0xff] (!%p250_p2)   ;;  %v1806_v7 = vld [vmem:[%s2336_s3 + $0x50] sm:$0xff] (!%p250_p2)   ;;  %s1508_s19 = sshll.u32 (!%p250_p2), %s1503_s25, 2  ;;  %v413_v40 = vlaneseq (!%p250_p2) }
   0x6   : > { %253 = sbr.rel (%p250_p2) target bundleno = 796 (0x31c), region = 48  ;;  %p293_p3 = scmp.lt.s32.totalorder (!%p250_p2), %s1510_s26, 3  ;;  %1762 = vmatprep.mubr.msk.f32.mxu0 (!%p250_p2), %vm315_vm0, %v311_v0  ;;  %v1801_v1 = vld [vmem:[%s2336_s3 + $0x40] sm:$0xff] (!%p250_p2)   ;;  %v1804_v4 = vld [vmem:[%s2336_s3 + $0x8] sm:$0xff] (!%p250_p2)   ;;  %v1808_v11 = vld [vmem:[%s2336_s3 + $0x10] sm:$0xff] (!%p250_p2)   ;;  %vm1913_vm4 = vmmov (!%p250_p2), 1  }
   0x7   : > { %v1802_v2 = vld [vmem:[%s2336_s3] sm:$0xff] (!%p250_p2)   ;;  %1636 = vmatprep.subr.bf16.mxu1 (!%p250_p2), %v1801_v1  ;;  %v312_v10 = vld [vmem:[%s2335_s2 + $0x8] sm:$0xff] (!%p250_p2)  ;;  %v313_v12 = vld [vmem:[%s2335_s2 + $0x10] sm:$0xff] (!%p250_p2)  ;;  %p287_p4 = scmp.lt.s32.totalorder (!%p250_p2), %s1508_s19, 7  ;;  %v2094_v41 = vshrl.u32 (!%p250_p2), %v413_v40, 7 }
   0x8   : > { %1637 = vmatpush3.bf16.msra.mxu1 (!%p250_p2), %v1802_v2  ;;  %v1805_v9 = vld [vmem:[%s2336_s3 + $0xc0] sm:$0xff] (!%p250_p2)   ;;  %v1810_v14 = vld [vmem:[%s2336_s3 + $0x58] sm:$0xff] (!%p250_p2)   ;;  %v1809_v15 = vld [vmem:[%s2336_s3 + $0xc8] sm:$0xff] (!%p250_p2)  }
   0x9   : > { %1638 = vmatprep.subr.bf16.mxu1 (!%p250_p2), %v1803_v3  ;;  %v1807_v13 = vld [vmem:[%s2336_s3 + $0x80] sm:$0xff] (!%p250_p2)   ;;  %v314_v16 = vld [vmem:[%s2335_s2 + $0x18] sm:$0xff] (!%p250_p2)  ;;  %v1811_v18 = vld [vmem:[%s2336_s3 + $0x88] sm:$0xff] (!%p250_p2)   ;;  %vm430_vm1 = vcmp.lt.s32.totalorder (!%p250_p2), %v2094_v41, 1  ;;  %vm459_vm2 = vcmp.lt.s32.totalorder (!%p250_p2), %v2094_v41, 7  ;;  %vm1628_vm3 = vcmp.ne.s32.totalorder (!%p250_p2), %v2094_v41, 0 }
   0xa   : > { %v1812_v17 = vld [vmem:[%s2336_s3 + $0x18] sm:$0xff] (!%p250_p2)   ;;  %v1814_v19 = vld [vmem:[%s2336_s3 + $0x60] sm:$0xff] (!%p250_p2)   ;;  %v1813_v20 = vld [vmem:[%s2336_s3 + $0xd0] sm:$0xff] (!%p250_p2)  }
   0xb   : > { %v1816_v21 = vld [vmem:[%s2336_s3 + $0x20] sm:$0xff] (!%p250_p2)   ;;  %v1815_v22 = vld [vmem:[%s2336_s3 + $0x90] sm:$0xff] (!%p250_p2)   ;;  %v1818_v23 = vld [vmem:[%s2336_s3 + $0x68] sm:$0xff] (!%p250_p2)  }
   0xc   : > { %1639 = vmatpush3.bf16.msra.mxu1 (!%p250_p2), %v1804_v4  ;;  %v1817_v24 = vld [vmem:[%s2336_s3 + $0xd8] sm:$0xff] (!%p250_p2)   ;;  %v1820_v25 = vld [vmem:[%s2336_s3 + $0x28] sm:$0xff] (!%p250_p2)   ;;  %v1822_v27 = vld [vmem:[%s2336_s3 + $0x70] sm:$0xff] (!%p250_p2)  }
   0xd   : > { %s2346_s26 = smov (!%p293_p3, %s1510_s26), 3  ;;  %1640 = vmatprep.subr.bf16.mxu1 %v1806_v7  ;;  %v1819_v26 = vld [vmem:[%s2336_s3 + $0x98] sm:$0xff]   ;;  %v1821_v28 = vld [vmem:[%s2336_s3 + $0xe0] sm:$0xff]   ;;  %v1824_v30 = vld [vmem:[%s2336_s3 + $0x30] sm:$0xff]   ;;  %s2348_s19 = smov (!%p287_p4, %s1508_s19), 7 }
   0xe   : > { %s1511_s12 = sshll.u32 %s2346_s26, 3  ;;  %v1823_v29 = vld [vmem:[%s2336_s3 + $0xa0] sm:$0xff]   ;;  %v1825_v31 = vld [vmem:[%s2336_s3 + $0xe8] sm:$0xff]   ;;  %v1826_v32 = vld [vmem:[%s2336_s3 + $0x78] sm:$0xff]   ;;  %s1509_s20 = sshll.u32 %s2348_s19, 3 }
   0xf   : > { %s296_s17 = scalar_lea.vmem %s2334_s1, %s1511_s12  ;;  %v1827_v33 = vld [vmem:[%s2336_s3 + $0xa8] sm:$0xff]   ;;  %v1828_v34 = vld [vmem:[%s2336_s3 + $0x38] sm:$0xff]   ;;  %v1829_v35 = vld [vmem:[%s2336_s3 + $0xf0] sm:$0xff]   ;;  %s2092_s23 = scalar_lea.vmem %s2333_s0, %s1509_s20 }
  0x10   : > { %v309_v5 = vld [vmem:[%s296_s17] sm:$0xff]  ;;  %v310_v6 = vld [vmem:[%s296_s17 + $0x8] sm:$0xff]  ;;  %1641 = vmatpush3.bf16.msra.mxu1 %v1808_v11  ;;  %v1830_v36 = vld [vmem:[%s2336_s3 + $0xb0] sm:$0xff]   ;;  %s302_s10 = scalar_lea.vmem %s2340_s7, %s1509_s20 }
  0x11   : > { %v1788_v8 = vpack.c.bf16 %v310_v6, %v309_v5  ;;  %1642 = vmatprep.subr.bf16.mxu1 %v1810_v14  ;;  %v1831_v37 = vld [vmem:[%s2336_s3 + $0x140] sm:$0xff]   ;;  %v1833_v38 = vld [vmem:[%s2336_s3 + $0xf8] sm:$0xff]   ;;  %v2103_v44 = vld [vmem:[%s2092_s23 + $0x8] sm:$0xff] }
  0x12   : > { %v1834_v39 = vld [vmem:[%s2336_s3 + $0xb8] sm:$0xff]   ;;  %v2100_v43 = vld [vmem:[%s2092_s23] sm:$0xff]  ;;  %v424_v46 = vrot.slane %v2103_v44, 7  ;;  %v1835_v59 = vld [vmem:[%s2336_s3 + $0x148] sm:$0xff]  }
  0x13   : > { %1789 = vmatprep.subr.bf16.mxu0 %v1788_v8  ;;  %v2097_v42 = vld [vmem:[%s2092_s23 + $0x18] sm:$0xff]  ;;  %v422_v45 = vrot.slane %v2100_v43, 7  ;;  %v476_v52 = vpack.c.bf16 %v2103_v44, %v2100_v43  ;;  %v1832_v56 = vld [vmem:[%s2336_s3 + $0x100] sm:$0xff]   ;;  %v1836_v5 = vld [vmem:[%s2336_s3 + $0x108] sm:$0xff]  }
  0x14   : > { %1791 = vmatpush3.bf16.msra.mxu0 %v1788_v8  ;;  %1643 = vmatpush3.bf16.msra.mxu1 %v1812_v17  ;;  %v428_v47 = vrot.slane %v2097_v42, 7  ;;  %v2131_v6 = vld [vmem:[%s2092_s23 + $0x10] sm:$0xff]  ;;  %vm2140_vm5 = vmpackc.low %vm1913_vm4, %vm1628_vm3 }
  0x15   : > { %1664 = vmatprep.subr.bf16.mxu0 %v1805_v9  ;;  %1644 = vmatprep.subr.bf16.mxu1 %v1814_v19  ;;  %v435_v57 = vsel %vm430_vm1, %v422_v45, %v424_v46  ;;  %v1837_v11 = vld [vmem:[%s2336_s3 + $0x150] sm:$0xff]  }
  0x16   : > { %v437_v58 = vsel %vm430_vm1, %v428_v47, %v422_v45  ;;  %v457_v45 = vrot.slane %v2097_v42, 1 }
  0x17   : > { %1763 = vmatmul.mubr.msk.f32.vlgmr.msra.gmra.mrb[0].mxu0 %vm315_vm0, %v312_v10  ;;  %v1572_v9 = vpack.c.bf16 %v435_v57, %v437_v58  ;;  %v1857_v57 = vld [vmem:[%s2338_s5 + $0x10] sm:$0xff]   ;;  %v1858_v58 = vld [vmem:[%s2338_s5 + $0x98] sm:$0xff]  }
  0x18   : > { %1765 = vmatprep.mubr.msk.f32.mxu0 %vm315_vm0, %v313_v12  ;;  %1665 = vmatpush3.bf16.msra.mxu0 %v1807_v13  ;;  %v426_v12 = vrot.slane %v2131_v6, 7 }
  0x19   : > { %1666 = vmatprep.subr.bf16.mxu0 %v1809_v15  ;;  %1645 = vmatpush3.bf16.msra.mxu1 %v1816_v21  ;;  %v1838_v21 = vld [vmem:[%s2336_s3 + $0x110] sm:$0xff]  }
  0x1a   : > { %1646 = vmatprep.subr.bf16.mxu1 %v1818_v23  ;;  %v1839_v23 = vld [vmem:[%s2336_s3 + $0x158] sm:$0xff]  }
  0x1b   : > { %1766 = vmatmul.mubr.msk.f32.gmra.mrb[2].mxu0 %vm315_vm0, %v314_v16 }
  0x1c   : > { %1667 = vmatpush3.bf16.msra.mxu0 %v1811_v18  ;;  %v482_v18 = vpack.c.bf16 %v2097_v42, %v2131_v6  ;;  %v1849_v42 = vld [vmem:[%s2338_s5 + $0x80] sm:$0xff]  }
  0x1d   : > { %1668 = vmatprep.subr.bf16.mxu0 %v1813_v20  ;;  %1647 = vmatpush3.bf16.msra.mxu1 %v1820_v25  ;;  %v433_v25 = vsel %vm430_vm1, %v424_v46, %v426_v12  ;;  %v1621_v46 = vld [vmem:[%s2339_s6 + $0x1] ss:$0 sm:$0xff] }
  0x1e   : > { %1648 = vmatprep.subr.bf16.mxu1 %v1822_v27  ;;  %v1841_v27 = vld [vmem:[%s2336_s3 + $0x160] sm:$0xff]  }
  0x20   : > { %1669 = vmatpush3.bf16.msra.mxu0 %v1815_v22 }
  0x21   : > { %1670 = vmatprep.subr.bf16.mxu0 %v1817_v24  ;;  %1649 = vmatpush3.bf16.msra.mxu1 %v1824_v30  ;;  %v431_v24 = vsel %vm430_vm1, %v426_v12, %v428_v47  ;;  %v1843_v30 = vld [vmem:[%s2336_s3 + $0x168] sm:$0xff]  }
  0x22   : > { %1650 = vmatprep.subr.bf16.mxu1 %v1826_v32  ;;  %v1845_v32 = vld [vmem:[%s2336_s3 + $0x170] sm:$0xff]  }
  0x24   : > { %1671 = vmatpush3.bf16.msra.mxu0 %v1819_v26  ;;  %v1840_v26 = vld [vmem:[%s2336_s3 + $0x118] sm:$0xff]  }
  0x25   : > { %1672 = vmatprep.subr.bf16.mxu0 %v1821_v28  ;;  %1651 = vmatpush3.bf16.msra.mxu1 %v1828_v34  ;;  %v484_v28 = vpack.c.bf16 %v431_v24, %v433_v25  ;;  %v453_v34 = vrot.slane %v2103_v44, 1 }
  0x26   : > { %1692 = vmatprep.subr.bf16.mxu1 %v1831_v37  ;;  %v1847_v37 = vld [vmem:[%s2336_s3 + $0x178] sm:$0xff]  }
  0x28   : > { %1673 = vmatpush3.bf16.msra.mxu0 %v1823_v29  ;;  %v1842_v29 = vld [vmem:[%s2336_s3 + $0x120] sm:$0xff]  }
  0x29   : > { %1674 = vmatprep.subr.bf16.mxu0 %v1825_v31  ;;  %v1844_v31 = vld [vmem:[%s2336_s3 + $0x128] sm:$0xff]  }
  0x2c   : > { %1675 = vmatpush3.bf16.msra.mxu0 %v1827_v33  ;;  %v451_v33 = vrot.slane %v2100_v43, 1 }
  0x2d   : > { %1676 = vmatprep.subr.bf16.mxu0 %v1829_v35  ;;  %v455_v35 = vrot.slane %v2131_v6, 1  ;;  %v1870_v6 = vld [vmem:[%s2338_s5 + $0xb8] sm:$0xff]  }
  0x2e   : > { %v464_v43 = vsel %vm459_vm2, %v451_v33, %v453_v34 }
  0x2f   : > { %v462_v40 = vsel %vm459_vm2, %v453_v34, %v455_v35  ;;  %v460_v47 = vsel %vm459_vm2, %v455_v35, %v457_v45 }
  0x30   : > { %1677 = vmatpush3.bf16.msra.mxu0 %v1830_v36  ;;  %v1846_v36 = vld [vmem:[%s2336_s3 + $0x130] sm:$0xff]   ;;  %v480_v44 = vpack.c.bf16 %v462_v40, %v464_v43 }
  0x31   : > { %1678 = vmatprep.subr.bf16.mxu0 %v1833_v38  ;;  %v417_v38 = vadd.s32 24, %v2094_v41 }
  0x33   : > { %vm1629_vm6 = vcmp.ne.s32.totalorder %v417_v38, 31 }
  0x34   : > { %1679 = vmatpush3.bf16.msra.mxu0 %v1834_v39  ;;  %v1848_v39 = vld [vmem:[%s2336_s3 + $0x138] sm:$0xff]   ;;  %vm2209_vm7 = vmpackc.low %vm1629_vm6, %vm1913_vm4 }
  0xea   : > { %v1764_v48 = vpop.f32.mrb[0].mxu0 }
  0xeb   : > { %v425_v49 = vrot.slane %v1764_v48, 7  ;;  %v454_v50 = vrot.slane %v1764_v48, 1  ;;  %v394_v51 = vpop.f32.mrb[1].mxu0 }
  0xec   : > { %v423_v53 = vrot.slane %v394_v51, 7  ;;  %v452_v54 = vrot.slane %v394_v51, 1  ;;  %v477_v55 = vpack.c.bf16 %v1764_v48, %v394_v51  ;;  %v466_v48 = vsel %vm459_vm2, %v457_v45, %v451_v33  ;;  %v1851_v51 = vld [vmem:[%s2338_s5] sm:$0xff]  }
  0xee   : > { %v436_v60 = vsel %vm430_vm1, %v423_v53, %v425_v49  ;;  %v1767_v61 = vpop.f32.mrb[2].mxu0  ;;  %904 = vmatprep.mubr.bf16.mxu1 %v477_v55  ;;  %v465_v62 = vsel %vm459_vm2, %v452_v54, %v454_v50  ;;  %v1855_v55 = vld [vmem:[%s2338_s5 + $0x90] sm:$0xff]  }
  0xef   : > { %v429_v63 = vrot.slane %v1767_v61, 7  ;;  %v458_v0 = vrot.slane %v1767_v61, 1  ;;  %v404_v1 = vpop.f32.mrb[3].mxu0  ;;  %905 = vmatmul.mubr.bf16.vlgmr.msra.gmra.mrb[0].mxu1 %v476_v52  ;;  %v1852_v52 = vld [vmem:[%s2338_s5 + $0x88] sm:$0xff]  }
  0xf0   : > { %v427_v2 = vrot.slane %v404_v1, 7  ;;  %v456_v3 = vrot.slane %v404_v1, 1  ;;  %v483_v4 = vpack.c.bf16 %v1767_v61, %v404_v1  ;;  %1693 = vmatpush3.bf16.msra.mxu1 %v1832_v56  ;;  %v1856_v56 = vld [vmem:[%s2338_s5 + $0x50] sm:$0xff]   ;;  %v1861_v61 = vld [vmem:[%s2338_s5 + $0xa0] sm:$0xff]   ;;  %v1865_v1 = vld [vmem:[%s2338_s5 + $0x68] sm:$0xff]  }
  0xf1   : > { %v438_v7 = vsel %vm430_vm1, %v429_v63, %v423_v53  ;;  %v467_v8 = vsel %vm459_vm2, %v458_v0, %v452_v54  ;;  %1694 = vmatprep.subr.bf16.mxu1 %v1835_v59  ;;  %v1853_v53 = vld [vmem:[%s2338_s5 + $0x48] sm:$0xff]   ;;  %v1859_v59 = vld [vmem:[%s2338_s5 + $0x58] sm:$0xff]  }
  0xf2   : > { %v461_v13 = vsel %vm459_vm2, %v456_v3, %v458_v0  ;;  %v1568_v14 = vpack.c.bf16 %v436_v60, %v438_v7  ;;  %912 = vmatprep.mubr.bf16.mxu1 %v483_v4  ;;  %v432_v15 = vsel %vm430_vm1, %v427_v2, %v429_v63  ;;  %v434_v16 = vsel %vm430_vm1, %v425_v49, %v427_v2  ;;  %v1854_v54 = vld [vmem:[%s2338_s5 + $0x8] sm:$0xff]   ;;  %v1860_v60 = vld [vmem:[%s2338_s5 + $0x18] sm:$0xff]   ;;  %v1863_v63 = vld [vmem:[%s2338_s5 + $0x20] sm:$0xff]  }
  0xf3   : > { %v485_v17 = vpack.c.bf16 %v432_v15, %v434_v16  ;;  %v463_v19 = vsel %vm459_vm2, %v454_v50, %v456_v3  ;;  %v1576_v20 = vpack.c.bf16 %v467_v8, %v461_v13  ;;  %v1580_v49 = vpack.c.bf16 %v466_v48, %v460_v47  ;;  %v1850_v50 = vld [vmem:[%s2338_s5 + $0x40] sm:$0xff]   ;;  %v1864_v0 = vld [vmem:[%s2338_s5 + $0xa8] sm:$0xff]   ;;  %v1867_v3 = vld [vmem:[%s2338_s5 + $0xb0] sm:$0xff]  }
  0xf4   : > { %1695 = vmatpush3.bf16.msra.mxu1 %v1836_v5  ;;  %1569 = vmatprep.mubr.msk.bf16.mxu0 %vm2140_vm5, %v1568_v14  ;;  %v481_v22 = vpack.c.bf16 %v463_v19, %v465_v62  ;;  %v1862_v62 = vld [vmem:[%s2338_s5 + $0x60] sm:$0xff]   ;;  %v1866_v2 = vld [vmem:[%s2338_s5 + $0x28] sm:$0xff]   ;;  %v1868_v4 = vld [vmem:[%s2338_s5 + $0x70] sm:$0xff]  }
  0xf5   : > { %1573 = vmatmul.mubr.msk.bf16.vlgmr.msra.gmra.mrb[4].mxu0 %vm2140_vm5, %v1572_v9  ;;  %1696 = vmatprep.subr.bf16.mxu1 %v1837_v11  ;;  %v1869_v5 = vld [vmem:[%s2338_s5 + $0x30] sm:$0xff]   ;;  %v1871_v7 = vld [vmem:[%s2338_s5 + $0x78] sm:$0xff]  }
  0xf6   : > { %961 = vmatprep.mubr.bf16.mxu0 %v485_v17  ;;  %1720 = vmatprep.subr.bf16.mxu0 %v1850_v50  ;;  %v1872_v8 = vld [vmem:[%s2338_s5 + $0x38] sm:$0xff]  }
  0xf7   : > { %913 = vmatmul.mubr.bf16.gmra.mrb[4].mxu1 %v482_v18  ;;  %1721 = vmatpush3.bf16.msra.mxu0 %v1851_v51 }
  0xf8   : > { %1697 = vmatpush3.bf16.msra.mxu1 %v1838_v21  ;;  %1002 = vmatprep.mubr.bf16.mxu1 %v481_v22 }
  0xf9   : > { %1698 = vmatprep.subr.bf16.mxu1 %v1839_v23  ;;  %1722 = vmatprep.subr.bf16.mxu0 %v1853_v53 }
  0xfb   : > { %1723 = vmatpush3.bf16.msra.mxu0 %v1854_v54 }
  0xfc   : > { %1699 = vmatpush3.bf16.msra.mxu1 %v1840_v26  ;;  %1724 = vmatprep.subr.bf16.mxu0 %v1856_v56 }
  0xfd   : > { %1700 = vmatprep.subr.bf16.mxu1 %v1841_v27  ;;  %962 = vmatmul.mubr.bf16.gmra.mrb[8].mxu0 %v484_v28 }
  0xff   : > { %1725 = vmatpush3.bf16.msra.mxu0 %v1857_v57 }
 0x100   : > { %1701 = vmatpush3.bf16.msra.mxu1 %v1842_v29  ;;  %1726 = vmatprep.subr.bf16.mxu0 %v1859_v59 }
 0x101   : > { %1702 = vmatprep.subr.bf16.mxu1 %v1843_v30 }
 0x103   : > { %1727 = vmatpush3.bf16.msra.mxu0 %v1860_v60 }
 0x104   : > { %1703 = vmatpush3.bf16.msra.mxu1 %v1844_v31  ;;  %1728 = vmatprep.subr.bf16.mxu0 %v1862_v62 }
 0x105   : > { %1704 = vmatprep.subr.bf16.mxu1 %v1845_v32 }
 0x107   : > { %1729 = vmatpush3.bf16.msra.mxu0 %v1863_v63 }
 0x108   : > { %1705 = vmatpush3.bf16.msra.mxu1 %v1846_v36  ;;  %1730 = vmatprep.subr.bf16.mxu0 %v1865_v1 }
 0x109   : > { %1706 = vmatprep.subr.bf16.mxu1 %v1847_v37 }
 0x10b   : > { %1731 = vmatpush3.bf16.msra.mxu0 %v1866_v2 }
 0x10c   : > { %1707 = vmatpush3.bf16.msra.mxu1 %v1848_v39  ;;  %1732 = vmatprep.subr.bf16.mxu0 %v1868_v4 }
 0x10d   : > { %1768 = vmatprep.subr.bf16.mxu1 %v1849_v42 }
 0x10f   : > { %1003 = vmatmul.mubr.bf16.vlgmr.msra.gmra.mrb[8].mxu1 %v480_v44  ;;  %1733 = vmatpush3.bf16.msra.mxu0 %v1869_v5  ;;  %v1582_v44 = vld [vmem:[%s2337_s4] ss:$0 sm:$0xff] }
 0x110   : > { %1577 = vmatprep.mubr.msk.bf16.mxu1 %vm2209_vm7, %v1576_v20  ;;  %1769 = vmatpush3.bf16.msra.mxu1 %v1849_v42 }
 0x111   : > { %1770 = vmatprep.subr.bf16.mxu1 %v1852_v52  ;;  %1734 = vmatprep.subr.bf16.mxu0 %v1871_v7 }
 0x113   : > { %1735 = vmatpush3.bf16.msra.mxu0 %v1872_v8 }
 0x114   : > { %1771 = vmatpush3.bf16.msra.mxu1 %v1852_v52 }
 0x115   : > { %1772 = vmatprep.subr.bf16.mxu1 %v1855_v55 }
 0x117   : > { %1581 = vmatmul.mubr.msk.bf16.gmra.mrb[12].mxu1 %vm2209_vm7, %v1580_v49  ;;  %v1583_v49 = vld [vmem:[%s2337_s4 + $0x1] ss:$0 sm:$0xff] }
 0x118   : > { %1773 = vmatpush3.bf16.msra.mxu1 %v1855_v55 }
 0x119   : > { %1774 = vmatprep.subr.bf16.mxu1 %v1858_v58 }
 0x11c   : > { %1775 = vmatpush3.bf16.msra.mxu1 %v1858_v58 }
 0x11d   : > { %1776 = vmatprep.subr.bf16.mxu1 %v1861_v61 }
 0x120   : > { %1777 = vmatpush3.bf16.msra.mxu1 %v1861_v61 }
 0x121   : > { %1778 = vmatprep.subr.bf16.mxu1 %v1864_v0 }
 0x124   : > { %1779 = vmatpush3.bf16.msra.mxu1 %v1864_v0 }
 0x125   : > { %1780 = vmatprep.subr.bf16.mxu1 %v1867_v3 }
 0x128   : > { %1781 = vmatpush3.bf16.msra.mxu1 %v1867_v3 }
 0x129   : > { %1782 = vmatprep.subr.bf16.mxu1 %v1870_v6 }
 0x12c   : > { %1783 = vmatpush3.bf16.msra.mxu1 %v1870_v6 }
 0x1c2   : > { %v1652_v9 = vpop.f32.mrb[0].mxu1 }
 0x1c3   : > { %v1653_v11 = vpop.f32.mrb[1].mxu1 }
 0x1c4   : > { %v1654_v12 = vadd.f32 %v1653_v11, %v1652_v9  ;;  %v1655_v13 = vpop.f32.mrb[2].mxu1 }
 0x1c5   : > { %v1656_v14 = vpop.f32.mrb[3].mxu1 }
 0x1c6   : > { %v1657_v15 = vadd.f32 %v1656_v14, %v1655_v13 }
 0x1c8   : > { %v1680_v16 = vpop.f32.mrb[4].mxu0 }
 0x1c9   : > { %v1681_v17 = vpop.f32.mrb[5].mxu0 }
 0x1ca   : > { %v1682_v18 = vadd.f32 %v1681_v17, %v1680_v16  ;;  %v1683_v19 = vpop.f32.mrb[6].mxu0  ;;  %v1658_v20 = vpop.f32.mrb[4].mxu1 }
 0x1cb   : > { %v1684_v21 = vpop.f32.mrb[7].mxu0  ;;  %v1659_v22 = vpop.f32.mrb[5].mxu1 }
 0x1cc   : > { %v956_v23 = vadd.f32 %v1682_v18, %v1654_v12  ;;  %v1685_v24 = vadd.f32 %v1684_v21, %v1683_v19  ;;  %v1660_v25 = vadd.f32 %v1659_v22, %v1658_v20  ;;  %v1661_v26 = vpop.f32.mrb[6].mxu1 }
 0x1cd   : > { %v1662_v27 = vpop.f32.mrb[7].mxu1 }
 0x1ce   : > { %v959_v28 = vadd.f32 %v1685_v24, %v1657_v15  ;;  %v1663_v29 = vadd.f32 %v1662_v27, %v1661_v26 }
 0x1d0   : > { %v1686_v30 = vpop.f32.mrb[8].mxu0 }
 0x1d1   : > { %v1687_v31 = vpop.f32.mrb[9].mxu0 }
 0x1d2   : > { %v1688_v32 = vadd.f32 %v1687_v31, %v1686_v30  ;;  %v1689_v33 = vpop.f32.mrb[10].mxu0 }
 0x1d3   : > { %v1690_v34 = vpop.f32.mrb[11].mxu0 }
 0x1d4   : > { %v964_v35 = vadd.f32 %v1688_v32, %v1660_v25  ;;  %v1691_v36 = vadd.f32 %v1690_v34, %v1689_v33 }
 0x1d6   : > { %v967_v37 = vadd.f32 %v1691_v36, %v1663_v29 }
 0x1e2   : > { %v1708_v38 = vpop.f32.mrb[8].mxu1 }
 0x1e3   : > { %v1709_v39 = vpop.f32.mrb[9].mxu1 }
 0x1e4   : > { %v1710_v40 = vadd.f32 %v1709_v39, %v1708_v38  ;;  %v1711_v43 = vpop.f32.mrb[10].mxu1 }
 0x1e5   : > { %v1712_v45 = vpop.f32.mrb[11].mxu1 }
 0x1e6   : > { %v1005_v47 = vadd.f32 %v1710_v40, %v956_v23  ;;  %v1713_v48 = vadd.f32 %v1712_v45, %v1711_v43 }
 0x1e8   : > { %v1024_v42 = vmul.f32 %v1582_v44, %v1005_v47  ;;  %v1008_v50 = vadd.f32 %v1713_v48, %v959_v28 }
 0x1ea   : > { %v1033_v51 = vadd.f32 %v1583_v49, %v1024_v42  ;;  %v1025_v52 = vmul.f32 %v1582_v44, %v1008_v50  ;;  %v1714_v53 = vpop.f32.mrb[12].mxu1 }
 0x1eb   : > { %v1715_v54 = vpop.f32.mrb[13].mxu1 }
 0x1ec   : > { %v1584_v55 = vmul.f32 -1.442695, %v1033_v51  ;;  %v1034_v56 = vadd.f32 %v1583_v49, %v1025_v52  ;;  %v1716_v57 = vadd.f32 %v1715_v54, %v1714_v53  ;;  %v1717_v58 = vpop.f32.mrb[14].mxu1  ;;  %v1620_v54 = vld [vmem:[%s2339_s6] ss:$0 sm:$0xff] }
 0x1ed   : > { %v1718_v59 = vpop.f32.mrb[15].mxu1 }
 0x1ee   : > { %1873 = vpow2.f32 %v1584_v55  ;;  %v1585_v60 = vmul.f32 -1.442695, %v1034_v56  ;;  %v1013_v61 = vadd.f32 %v1716_v57, %v964_v35  ;;  %v1719_v62 = vadd.f32 %v1718_v59, %v1717_v58 }
 0x1f0   : > { %1875 = vpow2.f32 %v1585_v60  ;;  %v1026_v63 = vmul.f32 %v1582_v44, %v1013_v61  ;;  %v1016_v0 = vadd.f32 %v1719_v62, %v967_v37 }
 0x1f2   : > { %v1035_v1 = vadd.f32 %v1583_v49, %v1026_v63  ;;  %v1027_v2 = vmul.f32 %v1582_v44, %v1016_v0 }
 0x1f4   : > { %v1586_v3 = vmul.f32 -1.442695, %v1035_v1  ;;  %v1036_v4 = vadd.f32 %v1583_v49, %v1027_v2 }
 0x1f6   : > { %1877 = vpow2.f32 %v1586_v3  ;;  %v1587_v5 = vmul.f32 -1.442695, %v1036_v4 }
 0x1f8   : > { %v1874_v6 = vpop.eup %1873  ;;  %1879 = vpow2.f32 %v1587_v5 }
 0x1f9   : > { %v1049_v7 = vadd.f32 1.0, %v1874_v6 }
 0x1fa   : > { %v1876_v8 = vpop.eup %1875 }
 0x1fb   : > { %1881 = vrcp.f32 %v1049_v7  ;;  %v1050_v9 = vadd.f32 1.0, %v1876_v8 }
 0x1fd   : > { %1883 = vrcp.f32 %v1050_v9 }
 0x200   : > { %v1878_v11 = vpop.eup %1877 }
 0x201   : > { %v1051_v12 = vadd.f32 1.0, %v1878_v11 }
 0x202   : > { %v1880_v13 = vpop.eup %1879 }
 0x203   : > { %1885 = vrcp.f32 %v1051_v12  ;;  %v1052_v14 = vadd.f32 1.0, %v1880_v13 }
 0x205   : > { %v1882_v15 = vpop.eup %1881  ;;  %1887 = vrcp.f32 %v1052_v14 }
 0x206   : > { %v1061_v16 = vmul.f32 %v1882_v15, %v1033_v51 }
 0x207   : > { %v1884_v17 = vpop.eup %1883 }
 0x208   : > { %v1062_v18 = vmul.f32 %v1884_v17, %v1034_v56  ;;  %v1077_v19 = vrot.slane %v1061_v16, 1  ;;  %v1065_v21 = vrot.slane %v1061_v16, 7 }
 0x20a   : > { %v1078_v20 = vrot.slane %v1062_v18, 1  ;;  %v1066_v22 = vrot.slane %v1062_v18, 7  ;;  %v1089_v23 = vpack.c.bf16 %v1062_v18, %v1061_v16 }
 0x20c   : > { %v1083_v24 = vsel %vm459_vm2, %v1077_v19, %v1078_v20  ;;  %v1071_v25 = vsel %vm430_vm1, %v1065_v21, %v1066_v22 }
 0x20d   : > { %v1886_v26 = vpop.eup %1885 }
 0x20e   : > { %v1063_v27 = vmul.f32 %v1886_v26, %v1035_v1 }
 0x20f   : > { %v1888_v28 = vpop.eup %1887 }
 0x210   : > { %v1064_v29 = vmul.f32 %v1888_v28, %v1036_v4  ;;  %v1079_v30 = vrot.slane %v1063_v27, 1  ;;  %v1067_v31 = vrot.slane %v1063_v27, 7 }
 0x212   : > { %v1080_v32 = vrot.slane %v1064_v29, 1  ;;  %v1082_v33 = vsel %vm459_vm2, %v1078_v20, %v1079_v30  ;;  %v1068_v34 = vrot.slane %v1064_v29, 7  ;;  %v1070_v35 = vsel %vm430_vm1, %v1066_v22, %v1067_v31 }
 0x213   : > { %v1091_v36 = vpack.c.bf16 %v1082_v33, %v1083_v24  ;;  %v1092_v37 = vpack.c.bf16 %v1064_v29, %v1063_v27 }
 0x214   : > { %v1081_v38 = vsel %vm459_vm2, %v1079_v30, %v1080_v32  ;;  %v1084_v39 = vsel %vm459_vm2, %v1080_v32, %v1077_v19  ;;  %v1072_v40 = vsel %vm430_vm1, %v1068_v34, %v1065_v21  ;;  %v1069_v43 = vsel %vm430_vm1, %v1067_v31, %v1068_v34 }
 0x215   : > { %1784 = vmatprep.mubr.bf16.mxu1 %v1091_v36  ;;  %v1618_v44 = vpack.c.bf16 %v1084_v39, %v1081_v38  ;;  %v1614_v45 = vpack.c.bf16 %v1071_v25, %v1072_v40  ;;  %v1093_v47 = vpack.c.bf16 %v1069_v43, %v1070_v35 }
 0x217   : > { %1615 = vmatprep.mubr.msk.bf16.mxu0 %vm2140_vm5, %v1614_v45  ;;  %1785 = vmatmul.mubr.msk.bf16.vlgmr.msra.gmra.mrb[16].mxu1 %vm2209_vm7, %v1618_v44 }
 0x218   : > { %1320 = vmatmul.mubr.bf16.vlgmr.msra.gmra.mrb[12].mxu0 %v1089_v23 }
 0x219   : > { %1327 = vmatprep.mubr.bf16.mxu0 %v1093_v47 }
 0x220   : > { %1328 = vmatmul.mubr.bf16.gmra.mrb[16].mxu0 %v1092_v37 }
 0x2ea   : > { %v1786_v48 = vpop.f32.mrb[16].mxu1 }
 0x2eb   : > { %v1736_v49 = vpop.f32.mrb[12].mxu0  ;;  %v1370_v42 = vpop.f32.mrb[17].mxu1 }
 0x2ec   : > { %v1737_v50 = vpop.f32.mrb[13].mxu0  ;;  %v1787_v51 = vpop.f32.mrb[18].mxu1 }
 0x2ed   : > { %v1738_v41 = vadd.f32 %v1737_v50, %v1736_v49  ;;  %v1739_v52 = vpop.f32.mrb[14].mxu0  ;;  %v1373_v53 = vpop.f32.mrb[19].mxu1 }
 0x2ee   : > { %v1740_v10 = vpop.f32.mrb[15].mxu0 }
 0x2ef   : > { %v1371_v55 = vadd.f32 %v1738_v41, %v1370_v42  ;;  %v1741_v56 = vadd.f32 %v1740_v10, %v1739_v52 }
 0x2f1   : > { %v1390_v57 = vmul.f32 %v1620_v54, %v1371_v55  ;;  %v1374_v58 = vadd.f32 %v1741_v56, %v1373_v53 }
 0x2f3   : > { %v1399_v59 = vadd.f32 %v1621_v46, %v1390_v57  ;;  %v1391_v60 = vmul.f32 %v1620_v54, %v1374_v58  ;;  %v1742_v61 = vpop.f32.mrb[16].mxu0 }
 0x2f4   : > { %v1743_v62 = vpop.f32.mrb[17].mxu0 }
 0x2f5   : > { %v1622_v63 = vmul.f32 -1.442695, %v1399_v59  ;;  %v1400_v0 = vadd.f32 %v1621_v46, %v1391_v60  ;;  %v1744_v1 = vadd.f32 %v1743_v62, %v1742_v61  ;;  %v1745_v2 = vpop.f32.mrb[18].mxu0 }
 0x2f6   : > { %v1746_v3 = vpop.f32.mrb[19].mxu0 }
 0x2f7   : > { %1889 = vpow2.f32 %v1622_v63  ;;  %v1623_v4 = vmul.f32 -1.442695, %v1400_v0  ;;  %v1379_v5 = vadd.f32 %v1786_v48, %v1744_v1  ;;  %v1747_v6 = vadd.f32 %v1746_v3, %v1745_v2 }
 0x2f9   : > { %1891 = vpow2.f32 %v1623_v4  ;;  %v1392_v7 = vmul.f32 %v1620_v54, %v1379_v5  ;;  %v1382_v8 = vadd.f32 %v1787_v51, %v1747_v6 }
 0x2fb   : > { %v1401_v9 = vadd.f32 %v1621_v46, %v1392_v7  ;;  %v1393_v11 = vmul.f32 %v1620_v54, %v1382_v8 }
 0x2fd   : > { %v1624_v12 = vmul.f32 -1.442695, %v1401_v9  ;;  %v1402_v13 = vadd.f32 %v1621_v46, %v1393_v11 }
 0x2ff   : > { %1893 = vpow2.f32 %v1624_v12  ;;  %v1625_v14 = vmul.f32 -1.442695, %v1402_v13 }
 0x301   : > { %v1890_v15 = vpop.eup %1889  ;;  %1895 = vpow2.f32 %v1625_v14 }
 0x302   : > { %v1415_v16 = vadd.f32 1.0, %v1890_v15 }
 0x303   : > { %v1892_v17 = vpop.eup %1891 }
 0x304   : > { %1897 = vrcp.f32 %v1415_v16  ;;  %v1416_v18 = vadd.f32 1.0, %v1892_v17 }
 0x306   : > { %1899 = vrcp.f32 %v1416_v18 }
 0x309   : > { %v1894_v19 = vpop.eup %1893 }
 0x30a   : > { %v1417_v20 = vadd.f32 1.0, %v1894_v19 }
 0x30b   : > { %v1896_v21 = vpop.eup %1895 }
 0x30c   : > { %1901 = vrcp.f32 %v1417_v20  ;;  %v1418_v22 = vadd.f32 1.0, %v1896_v21 }
 0x30e   : > { %v1898_v23 = vpop.eup %1897  ;;  %1903 = vrcp.f32 %v1418_v22 }
 0x30f   : > { %v1427_v24 = vmul.f32 %v1898_v23, %v1399_v59 }
 0x310   : > { %v1900_v25 = vpop.eup %1899 }
 0x311   : > { %1431 = vst [vmem:[%s302_s10] sm:$0xff] %v1427_v24  ;;  %v1428_v26 = vmul.f32 %v1900_v25, %v1400_v0 }
 0x313   : > { %1432 = vst [vmem:[%s302_s10 + $0x8] sm:$0xff] %v1428_v26 }
 0x316   : > { %v1902_v27 = vpop.eup %1901 }
 0x317   : > { %v1429_v28 = vmul.f32 %v1902_v27, %v1401_v9 }
 0x318   : > { %v1904_v29 = vpop.eup %1903 }
 0x319   : > { %1433 = vst [vmem:[%s302_s10 + $0x10] sm:$0xff] %v1429_v28  ;;  %v1430_v30 = vmul.f32 %v1904_v29, %v1402_v13 }
 0x31b   : > { %1434 = vst [vmem:[%s302_s10 + $0x18] sm:$0xff] %v1430_v30 }
 0x31c PF: > { %s17_s24 = sadd.s32 1, %s1911_s24  }
 0x31d   : > { %p14_p5 = scmp.ge.s32.totalorder %s17_s24, 4  }
 0x31f   :  { %16 = sbr.rel (!%p14_p5) target bundleno = 1 (0x1), region = 81 }

</bundles_post_ra>
